<compile_context>
chip_gen: v6e
topology: v6e:2x2x1
jax: 0.10.0
libtpu: 0.0.40
codegen_flags: <defaults>
</compile_context>

<pallas_src>
import functools

import jax
import jax.numpy as jnp
from jax.experimental import pallas as pl
from jax.experimental.pallas import tpu as pltpu

# Small, forward-consistent sizes (d_model divisible by heads, d_k = d_model / h).
D_MODEL = 32
D_K = 8
D_V = 8
N_HEADS = 4
D_FF = 64
LN_EPS = 1e-5

# Set to jnp.bfloat16 on v6e/v7x for higher MXU rate / less VMEM traffic (f32
# accumulation is kept via preferred_element_type).  Left at f32 here so the
# numerics match the reference module as closely as possible.
MATMUL_DTYPE = jnp.float32


# ---------------------------------------------------------------------------
# In-kernel helpers
# ---------------------------------------------------------------------------

def _mm(a, b):
    # a @ b with f32 accumulation on the MXU.
    return jnp.dot(a.astype(MATMUL_DTYPE), b.astype(MATMUL_DTYPE),
                   preferred_element_type=jnp.float32)


def _mm_t(a, b):
    # a:(M,K) @ b:(N,K)^T -> (M,N)
    return jnp.dot(a.astype(MATMUL_DTYPE), b.astype(MATMUL_DTYPE).T,
                   preferred_element_type=jnp.float32)


def _add_layernorm(y, gamma, beta):
    # LayerNorm over the last dim (PyTorch semantics, biased variance), f32 math.
    mean = jnp.mean(y, axis=-1, keepdims=True)
    var = jnp.mean(jnp.square(y - mean), axis=-1, keepdims=True)
    return (y - mean) * jax.lax.rsqrt(var + LN_EPS) * gamma + beta


# ---------------------------------------------------------------------------
# Fused MultiHeadAttention kernel: QKV proj + attention (all heads) + out proj
#                                  + residual + LayerNorm, one batch per step.
# ---------------------------------------------------------------------------

def _fused_mha_kernel(*refs, has_gw):
    if has_gw:
        (q_ref, kv_ref, gw_ref, wq_ref, bq_ref, wkv_ref, bkv_ref,
         wo_ref, bo_ref, g_ref, beta_ref, o_ref) = refs
    else:
        (q_ref, kv_ref, wq_ref, bq_ref, wkv_ref, bkv_ref,
         wo_ref, bo_ref, g_ref, beta_ref, o_ref) = refs
        gw_ref = None

    x_q = q_ref[0]                                    # (Sq, D)
    x_kv = kv_ref[0]                                  # (Sk, D)

    # Projections.  wq/bq are pre-scaled by 1/sqrt(d_k); wkv = [wk | wv].
    q = _mm(x_q, wq_ref[...]) + bq_ref[...]           # (Sq, H*d_k)
    kv = _mm(x_kv, wkv_ref[...]) + bkv_ref[...]       # (Sk, H*(d_k+d_v))
    k = kv[:, : N_HEADS * D_K]
    v = kv[:, N_HEADS * D_K:]

    heads = []
    for h in range(N_HEADS):                          # static unroll, all in VMEM
        q_h = q[:, h * D_K:(h + 1) * D_K]
        k_h = k[:, h * D_K:(h + 1) * D_K]
        v_h = v[:, h * D_V:(h + 1) * D_V]
        s = _mm_t(q_h, k_h)                           # (Sq, Sk), already scaled
        if gw_ref is not None:
            s = s * gw_ref[0, h]                      # M2-style multiplicative geo weights
        m = jnp.max(s, axis=-1, keepdims=True)
        p = jnp.exp(s - m)
        p = p * pl.reciprocal(jnp.sum(p, axis=-1, keepdims=True), approx=True)
        heads.append(_mm(p, v_h))                     # (Sq, d_v)
    att = jnp.concatenate(heads, axis=-1)             # (Sq, H*d_v)

    out = _mm(att, wo_ref[...]) + bo_ref[...]         # (Sq, D)
    o_ref[0] = _add_layernorm(x_q + out, g_ref[...], beta_ref[...])


def _full_spec(arr):
    # Whole-array block whose index never changes -> DMA'd once, stays resident.
    nd = arr.ndim
    return pl.BlockSpec(arr.shape, lambda b, _nd=nd: (0,) * _nd)


def fused_mha(p, queries, keys_values, attention_weights=None):
    """LN(queries + MHA(queries, keys_values, keys_values))  (keys == values here)."""
    B, Sq, D = queries.shape
    Sk = keys_values.shape[1]

    scale = 1.0 / float(D_K) ** 0.5
    wq = p["wq"] * scale                              # fold 1/sqrt(d_k) into the projection
    bq = p["bq"] * scale
    wkv = jnp.concatenate([p["wk"], p["wv"]], axis=1)
    bkv = jnp.concatenate([p["bk"], p["bv"]], axis=1)

    has_gw = attention_weights is not None
    args = [queries, keys_values]
    in_specs = [
        pl.BlockSpec((1, Sq, D), lambda b: (b, 0, 0)),
        pl.BlockSpec((1, Sk, D), lambda b: (b, 0, 0)),
    ]
    if has_gw:
        args.append(attention_weights.astype(jnp.float32))
        in_specs.append(pl.BlockSpec((1, N_HEADS, Sq, Sk), lambda b: (b, 0, 0, 0)))

    weights = [wq, bq, wkv, bkv, p["wo"], p["bo"], p["ln_g"], p["ln_b"]]
    args += weights
    in_specs += [_full_spec(w) for w in weights]

    kern = functools.partial(_fused_mha_kernel, has_gw=has_gw)
    return pl.pallas_call(
        kern,
        out_shape=jax.ShapeDtypeStruct((B, Sq, D), jnp.float32),
        grid=(B,),
        in_specs=in_specs,
        out_specs=pl.BlockSpec((1, Sq, D), lambda b: (b, 0, 0)),
        compiler_params=pltpu.CompilerParams(
            dimension_semantics=("parallel",)),
    )(*args)


# ---------------------------------------------------------------------------
# Fused PositionWiseFeedForward kernel: fc1 + ReLU + fc2 + residual + LayerNorm
# ---------------------------------------------------------------------------

def _fused_ffn_kernel(x_ref, w1_ref, b1_ref, w2_ref, b2_ref, g_ref, beta_ref, o_ref):
    x = x_ref[0]                                      # (S, D)
    h = jnp.maximum(_mm(x, w1_ref[...]) + b1_ref[...], 0.0)
    y = x + _mm(h, w2_ref[...]) + b2_ref[...]         # dropout = identity (eval)
    o_ref[0] = _add_layernorm(y, g_ref[...], beta_ref[...])


def fused_pwff(p, x):
    B, S, D = x.shape
    weights = [p["w1"], p["b1"], p["w2"], p["b2"], p["ln_g"], p["ln_b"]]
    in_specs = [pl.BlockSpec((1, S, D), lambda b: (b, 0, 0))]
    in_specs += [_full_spec(w) for w in weights]
    return pl.pallas_call(
        _fused_ffn_kernel,
        out_shape=jax.ShapeDtypeStruct((B, S, D), jnp.float32),
        grid=(B,),
        in_specs=in_specs,
        out_specs=pl.BlockSpec((1, S, D), lambda b: (b, 0, 0)),
        compiler_params=pltpu.CompilerParams(
            dimension_semantics=("parallel",)),
    )(x, *weights)


# ---------------------------------------------------------------------------
# Encoder layer (keys == values == grid_features in both attention blocks)
# ---------------------------------------------------------------------------

def encoder_layer(params, grid_features, object_queries, geometric_attention=None):
    grid_att = fused_mha(params["self_att"], grid_features, grid_features,
                         attention_weights=geometric_attention)
    object_att = fused_mha(params["cross_att"], object_queries, grid_features)
    grid_ff = fused_pwff(params["self_pwff"], grid_att)
    object_ff = fused_pwff(params["cross_pwff"], object_att)
    return grid_ff, object_ff


# ---------------------------------------------------------------------------
# Deterministic parameter init
# ---------------------------------------------------------------------------

def _dense(key, fan_in, fan_out):
    k1, k2 = jax.random.split(key)
    w = jax.random.normal(k1, (fan_in, fan_out), jnp.float32) / jnp.sqrt(
        jnp.float32(fan_in))
    b = 0.01 * jax.random.normal(k2, (1, fan_out), jnp.float32)
    return w, b


def _mha_params(key):
    ks = jax.random.split(key, 4)
    wq, bq = _dense(ks[0], D_MODEL, N_HEADS * D_K)
    wk, bk = _dense(ks[1], D_MODEL, N_HEADS * D_K)
    wv, bv = _dense(ks[2], D_MODEL, N_HEADS * D_V)
    wo, bo = _dense(ks[3], N_HEADS * D_V, D_MODEL)
    return dict(wq=wq, bq=bq, wk=wk, bk=bk, wv=wv, bv=bv, wo=wo, bo=bo,
                ln_g=jnp.ones((1, D_MODEL), jnp.float32),
                ln_b=jnp.zeros((1, D_MODEL), jnp.float32))


def _pwff_params(key):
    k1, k2 = jax.random.split(key)
    w1, b1 = _dense(k1, D_MODEL, D_FF)
    w2, b2 = _dense(k2, D_FF, D_MODEL)
    return dict(w1=w1, b1=b1, w2=w2, b2=b2,
                ln_g=jnp.ones((1, D_MODEL), jnp.float32),
                ln_b=jnp.zeros((1, D_MODEL), jnp.float32))


def init_encoder_layer_params(key):
    ks = jax.random.split(key, 4)
    return dict(self_att=_mha_params(ks[0]),
                cross_att=_mha_params(ks[1]),
                self_pwff=_pwff_params(ks[2]),
                cross_pwff=_pwff_params(ks[3]))


# ---------------------------------------------------------------------------

if __name__ == "__main__":
    key = jax.random.PRNGKey(0)
    k_param, k_grid, k_obj, k_geo = jax.random.split(key, 4)

    B, S_GRID, S_OBJ = 2, 16, 8
    params = init_encoder_layer_params(k_param)
    grid_features = jax.random.normal(k_grid, (B, S_GRID, D_MODEL), jnp.float32)
    object_queries = jax.random.normal(k_obj, (B, S_OBJ, D_MODEL), jnp.float32)
    geometric_attention = jnp.abs(
        jax.random.normal(k_geo, (B, N_HEADS, S_GRID, S_GRID), jnp.float32))

    grid_ff, object_ff = jax.jit(encoder_layer)(
        params, grid_features, object_queries, geometric_attention)
    jax.block_until_ready((grid_ff, object_ff))

    assert grid_ff.shape == (B, S_GRID, D_MODEL)
    assert object_ff.shape == (B, S_OBJ, D_MODEL)
    assert jnp.all(jnp.isfinite(grid_ff)) and jnp.all(jnp.isfinite(object_ff))
    print("KERNEL_OK")
</pallas_src>

<mosaic_0001>
module attributes {stable_mosaic.version = 11 : i64} {
  func.func @_fused_ffn_kernel(%arg0: i32, %arg1: memref<1x16x32xf32, #tpu.memory_space<vmem>>, %arg2: memref<32x64xf32, #tpu.memory_space<vmem>>, %arg3: memref<1x64xf32, #tpu.memory_space<vmem>>, %arg4: memref<64x32xf32, #tpu.memory_space<vmem>>, %arg5: memref<1x32xf32, #tpu.memory_space<vmem>>, %arg6: memref<1x32xf32, #tpu.memory_space<vmem>>, %arg7: memref<1x32xf32, #tpu.memory_space<vmem>>, %arg8: memref<1x16x32xf32, #tpu.memory_space<vmem>>) attributes {dimension_semantics = [#tpu.dimension_semantics<parallel>], iteration_bounds = array<i64: 2>, scalar_prefetch = 0 : i64, scratch_operands = 0 : i64, tpu.core_type = #tpu.core_type<tc>, window_params = [{transform_indices = @transform_0, window_bounds = array<i64: 1, 16, 32>}, {pipeline_mode = #tpu.pipeline_mode<synchronous>, transform_indices = @transform_1, window_bounds = array<i64: 32, 64>}, {pipeline_mode = #tpu.pipeline_mode<synchronous>, transform_indices = @transform_2, window_bounds = array<i64: 1, 64>}, {pipeline_mode = #tpu.pipeline_mode<synchronous>, transform_indices = @transform_3, window_bounds = array<i64: 64, 32>}, {pipeline_mode = #tpu.pipeline_mode<synchronous>, transform_indices = @transform_4, window_bounds = array<i64: 1, 32>}, {pipeline_mode = #tpu.pipeline_mode<synchronous>, transform_indices = @transform_5, window_bounds = array<i64: 1, 32>}, {pipeline_mode = #tpu.pipeline_mode<synchronous>, transform_indices = @transform_6, window_bounds = array<i64: 1, 32>}, {transform_indices = @transform_7, window_bounds = array<i64: 1, 16, 32>}]} {
    %c0 = arith.constant 0 : index
    %c0_0 = arith.constant 0 : index
    %c0_1 = arith.constant 0 : index
    %0 = vector.load %arg1[%c0, %c0_0, %c0_1] : memref<1x16x32xf32, #tpu.memory_space<vmem>>, vector<1x16x32xf32>
    %1 = vector.shape_cast %0 : vector<1x16x32xf32> to vector<16x32xf32>
    %c0_2 = arith.constant 0 : index
    %c0_3 = arith.constant 0 : index
    %2 = vector.load %arg2[%c0_2, %c0_3] : memref<32x64xf32, #tpu.memory_space<vmem>>, vector<32x64xf32>
    %cst = arith.constant dense<0.000000e+00> : vector<16x64xf32>
    %3 = tpu.matmul %1, %2, %cst {dimension_numbers = #tpu.dot_dimension_numbers<[1], [0], [0], [1], [0, 0, 1, 1], [], []>} : vector<16x32xf32>, vector<32x64xf32>, vector<16x64xf32> -> vector<16x64xf32>
    %c0_4 = arith.constant 0 : index
    %c0_5 = arith.constant 0 : index
    %4 = vector.load %arg3[%c0_4, %c0_5] : memref<1x64xf32, #tpu.memory_space<vmem>>, vector<1x64xf32>
    %5 = vector.broadcast %4 : vector<1x64xf32> to vector<16x64xf32>
    %6 = arith.addf %3, %5 : vector<16x64xf32>
    %cst_6 = arith.constant 0.000000e+00 : f32
    %7 = vector.broadcast %cst_6 : f32 to vector<16x64xf32>
    %8 = arith.maximumf %6, %7 : vector<16x64xf32>
    %c0_7 = arith.constant 0 : index
    %c0_8 = arith.constant 0 : index
    %9 = vector.load %arg4[%c0_7, %c0_8] : memref<64x32xf32, #tpu.memory_space<vmem>>, vector<64x32xf32>
    %cst_9 = arith.constant dense<0.000000e+00> : vector<16x32xf32>
    %10 = tpu.matmul %8, %9, %cst_9 {dimension_numbers = #tpu.dot_dimension_numbers<[1], [0], [0], [1], [0, 0, 1, 1], [], []>} : vector<16x64xf32>, vector<64x32xf32>, vector<16x32xf32> -> vector<16x32xf32>
    %11 = arith.addf %1, %10 : vector<16x32xf32>
    %c0_10 = arith.constant 0 : index
    %c0_11 = arith.constant 0 : index
    %12 = vector.load %arg5[%c0_10, %c0_11] : memref<1x32xf32, #tpu.memory_space<vmem>>, vector<1x32xf32>
    %13 = vector.broadcast %12 : vector<1x32xf32> to vector<16x32xf32>
    %14 = arith.addf %11, %13 : vector<16x32xf32>
    %c0_12 = arith.constant 0 : index
    %c0_13 = arith.constant 0 : index
    %15 = vector.load %arg6[%c0_12, %c0_13] : memref<1x32xf32, #tpu.memory_space<vmem>>, vector<1x32xf32>
    %c0_14 = arith.constant 0 : index
    %c0_15 = arith.constant 0 : index
    %16 = vector.load %arg7[%c0_14, %c0_15] : memref<1x32xf32, #tpu.memory_space<vmem>>, vector<1x32xf32>
    %cst_16 = arith.constant dense<0.000000e+00> : vector<16xf32>
    %17 = vector.multi_reduction <add>, %14, %cst_16 [1] : vector<16x32xf32> to vector<16xf32>
    %18 = vector.shape_cast %17 : vector<16xf32> to vector<16x1xf32>
    %cst_17 = arith.constant 3.200000e+01 : f32
    %19 = vector.broadcast %cst_17 : f32 to vector<16x1xf32>
    %20 = arith.divf %18, %19 : vector<16x1xf32>
    %21 = vector.broadcast %20 : vector<16x1xf32> to vector<16x32xf32>
    %22 = arith.subf %14, %21 : vector<16x32xf32>
    %23 = arith.mulf %22, %22 : vector<16x32xf32>
    %cst_18 = arith.constant dense<0.000000e+00> : vector<16xf32>
    %24 = vector.multi_reduction <add>, %23, %cst_18 [1] : vector<16x32xf32> to vector<16xf32>
    %25 = vector.shape_cast %24 : vector<16xf32> to vector<16x1xf32>
    %cst_19 = arith.constant 3.200000e+01 : f32
    %26 = vector.broadcast %cst_19 : f32 to vector<16x1xf32>
    %27 = arith.divf %25, %26 : vector<16x1xf32>
    %28 = vector.broadcast %20 : vector<16x1xf32> to vector<16x32xf32>
    %29 = arith.subf %14, %28 : vector<16x32xf32>
    %cst_20 = arith.constant 9.99999974E-6 : f32
    %30 = vector.broadcast %cst_20 : f32 to vector<16x1xf32>
    %31 = arith.addf %27, %30 : vector<16x1xf32>
    %32 = math.rsqrt %31 : vector<16x1xf32>
    %33 = vector.broadcast %32 : vector<16x1xf32> to vector<16x32xf32>
    %34 = arith.mulf %29, %33 : vector<16x32xf32>
    %35 = vector.broadcast %15 : vector<1x32xf32> to vector<16x32xf32>
    %36 = arith.mulf %34, %35 : vector<16x32xf32>
    %37 = vector.broadcast %16 : vector<1x32xf32> to vector<16x32xf32>
    %38 = arith.addf %36, %37 : vector<16x32xf32>
    %c0_21 = arith.constant 0 : index
    %c0_22 = arith.constant 0 : index
    %c0_23 = arith.constant 0 : index
    %39 = vector.load %arg8[%c0_21, %c0_22, %c0_23] : memref<1x16x32xf32, #tpu.memory_space<vmem>>, vector<1x16x32xf32>
    %40 = vector.shape_cast %39 : vector<1x16x32xf32> to vector<16x32xf32>
    %41 = vector.shape_cast %38 : vector<16x32xf32> to vector<1x16x32xf32>
    tpu.vector_store %arg8[%c0_21, %c0_22, %c0_23], %41 {strides = array<i32>} : memref<1x16x32xf32, #tpu.memory_space<vmem>>, vector<1x16x32xf32>,
    return
  }
  func.func @transform_0(%arg0: i32) -> (i32, i32, i32) {
    %c0_i32 = arith.constant 0 : i32
    %c0_i32_0 = arith.constant 0 : i32
    %c0_i32_1 = arith.constant 0 : i32
    return %arg0, %c0_i32, %c0_i32_0 : i32, i32, i32
  }
  func.func @transform_1(%arg0: i32) -> (i32, i32) {
    %c0_i32 = arith.constant 0 : i32
    %c0_i32_0 = arith.constant 0 : i32
    %c0_i32_1 = arith.constant 0 : i32
    return %c0_i32, %c0_i32_0 : i32, i32
  }
  func.func @transform_2(%arg0: i32) -> (i32, i32) {
    %c0_i32 = arith.constant 0 : i32
    %c0_i32_0 = arith.constant 0 : i32
    %c0_i32_1 = arith.constant 0 : i32
    return %c0_i32, %c0_i32_0 : i32, i32
  }
  func.func @transform_3(%arg0: i32) -> (i32, i32) {
    %c0_i32 = arith.constant 0 : i32
    %c0_i32_0 = arith.constant 0 : i32
    %c0_i32_1 = arith.constant 0 : i32
    return %c0_i32, %c0_i32_0 : i32, i32
  }
  func.func @transform_4(%arg0: i32) -> (i32, i32) {
    %c0_i32 = arith.constant 0 : i32
    %c0_i32_0 = arith.constant 0 : i32
    %c0_i32_1 = arith.constant 0 : i32
    return %c0_i32, %c0_i32_0 : i32, i32
  }
  func.func @transform_5(%arg0: i32) -> (i32, i32) {
    %c0_i32 = arith.constant 0 : i32
    %c0_i32_0 = arith.constant 0 : i32
    %c0_i32_1 = arith.constant 0 : i32
    return %c0_i32, %c0_i32_0 : i32, i32
  }
  func.func @transform_6(%arg0: i32) -> (i32, i32) {
    %c0_i32 = arith.constant 0 : i32
    %c0_i32_0 = arith.constant 0 : i32
    %c0_i32_1 = arith.constant 0 : i32
    return %c0_i32, %c0_i32_0 : i32, i32
  }
  func.func @transform_7(%arg0: i32) -> (i32, i32, i32) {
    %c0_i32 = arith.constant 0 : i32
    %c0_i32_0 = arith.constant 0 : i32
    %c0_i32_1 = arith.constant 0 : i32
    return %arg0, %c0_i32, %c0_i32_0 : i32, i32, i32
  }
}

module attributes {stable_mosaic.version = 11 : i64} {
  func.func @_fused_mha_kernel(%arg0: i32, %arg1: memref<1x16x32xf32, #tpu.memory_space<vmem>>, %arg2: memref<1x16x32xf32, #tpu.memory_space<vmem>>, %arg3: memref<1x4x16x16xf32, #tpu.memory_space<vmem>>, %arg4: memref<32x32xf32, #tpu.memory_space<vmem>>, %arg5: memref<1x32xf32, #tpu.memory_space<vmem>>, %arg6: memref<32x64xf32, #tpu.memory_space<vmem>>, %arg7: memref<1x64xf32, #tpu.memory_space<vmem>>, %arg8: memref<32x32xf32, #tpu.memory_space<vmem>>, %arg9: memref<1x32xf32, #tpu.memory_space<vmem>>, %arg10: memref<1x32xf32, #tpu.memory_space<vmem>>, %arg11: memref<1x32xf32, #tpu.memory_space<vmem>>, %arg12: memref<1x16x32xf32, #tpu.memory_space<vmem>>) attributes {dimension_semantics = [#tpu.dimension_semantics<parallel>], iteration_bounds = array<i64: 2>, scalar_prefetch = 0 : i64, scratch_operands = 0 : i64, tpu.core_type = #tpu.core_type<tc>, window_params = [{transform_indices = @transform_0, window_bounds = array<i64: 1, 16, 32>}, {transform_indices = @transform_1, window_bounds = array<i64: 1, 16, 32>}, {transform_indices = @transform_2, window_bounds = array<i64: 1, 4, 16, 16>}, {pipeline_mode = #tpu.pipeline_mode<synchronous>, transform_indices = @transform_3, window_bounds = array<i64: 32, 32>}, {pipeline_mode = #tpu.pipeline_mode<synchronous>, transform_indices = @transform_4, window_bounds = array<i64: 1, 32>}, {pipeline_mode = #tpu.pipeline_mode<synchronous>, transform_indices = @transform_5, window_bounds = array<i64: 32, 64>}, {pipeline_mode = #tpu.pipeline_mode<synchronous>, transform_indices = @transform_6, window_bounds = array<i64: 1, 64>}, {pipeline_mode = #tpu.pipeline_mode<synchronous>, transform_indices = @transform_7, window_bounds = array<i64: 32, 32>}, {pipeline_mode = #tpu.pipeline_mode<synchronous>, transform_indices = @transform_8, window_bounds = array<i64: 1, 32>}, {pipeline_mode = #tpu.pipeline_mode<synchronous>, transform_indices = @transform_9, window_bounds = array<i64: 1, 32>}, {pipeline_mode = #tpu.pipeline_mode<synchronous>, transform_indices = @transform_10, window_bounds = array<i64: 1, 32>}, {transform_indices = @transform_11, window_bounds = array<i64: 1, 16, 32>}]} {
    %c0 = arith.constant 0 : index
    %c0_0 = arith.constant 0 : index
    %c0_1 = arith.constant 0 : index
    %0 = vector.load %arg1[%c0, %c0_0, %c0_1] : memref<1x16x32xf32, #tpu.memory_space<vmem>>, vector<1x16x32xf32>
    %1 = vector.shape_cast %0 : vector<1x16x32xf32> to vector<16x32xf32>
    %c0_2 = arith.constant 0 : index
    %c0_3 = arith.constant 0 : index
    %c0_4 = arith.constant 0 : index
    %2 = vector.load %arg2[%c0_2, %c0_3, %c0_4] : memref<1x16x32xf32, #tpu.memory_space<vmem>>, vector<1x16x32xf32>
    %3 = vector.shape_cast %2 : vector<1x16x32xf32> to vector<16x32xf32>
    %c0_5 = arith.constant 0 : index
    %c0_6 = arith.constant 0 : index
    %4 = vector.load %arg4[%c0_5, %c0_6] : memref<32x32xf32, #tpu.memory_space<vmem>>, vector<32x32xf32>
    %cst = arith.constant dense<0.000000e+00> : vector<16x32xf32>
    %5 = tpu.matmul %1, %4, %cst {dimension_numbers = #tpu.dot_dimension_numbers<[1], [0], [0], [1], [0, 0, 1, 1], [], []>} : vector<16x32xf32>, vector<32x32xf32>, vector<16x32xf32> -> vector<16x32xf32>
    %c0_7 = arith.constant 0 : index
    %c0_8 = arith.constant 0 : index
    %6 = vector.load %arg5[%c0_7, %c0_8] : memref<1x32xf32, #tpu.memory_space<vmem>>, vector<1x32xf32>
    %7 = vector.broadcast %6 : vector<1x32xf32> to vector<16x32xf32>
    %8 = arith.addf %5, %7 : vector<16x32xf32>
    %c0_9 = arith.constant 0 : index
    %c0_10 = arith.constant 0 : index
    %9 = vector.load %arg6[%c0_9, %c0_10] : memref<32x64xf32, #tpu.memory_space<vmem>>, vector<32x64xf32>
    %cst_11 = arith.constant dense<0.000000e+00> : vector<16x64xf32>
    %10 = tpu.matmul %3, %9, %cst_11 {dimension_numbers = #tpu.dot_dimension_numbers<[1], [0], [0], [1], [0, 0, 1, 1], [], []>} : vector<16x32xf32>, vector<32x64xf32>, vector<16x64xf32> -> vector<16x64xf32>
    %c0_12 = arith.constant 0 : index
    %c0_13 = arith.constant 0 : index
    %11 = vector.load %arg7[%c0_12, %c0_13] : memref<1x64xf32, #tpu.memory_space<vmem>>, vector<1x64xf32>
    %12 = vector.broadcast %11 : vector<1x64xf32> to vector<16x64xf32>
    %13 = arith.addf %10, %12 : vector<16x64xf32>
    %14 = vector.extract_strided_slice %13 {offsets = [0, 0], sizes = [16, 32], strides = [1, 1]} : vector<16x64xf32> to vector<16x32xf32>
    %15 = vector.extract_strided_slice %13 {offsets = [0, 32], sizes = [16, 32], strides = [1, 1]} : vector<16x64xf32> to vector<16x32xf32>
    %16 = vector.extract_strided_slice %8 {offsets = [0, 0], sizes = [16, 8], strides = [1, 1]} : vector<16x32xf32> to vector<16x8xf32>
    %17 = vector.extract_strided_slice %14 {offsets = [0, 0], sizes = [16, 8], strides = [1, 1]} : vector<16x32xf32> to vector<16x8xf32>
    %18 = vector.extract_strided_slice %15 {offsets = [0, 0], sizes = [16, 8], strides = [1, 1]} : vector<16x32xf32> to vector<16x8xf32>
    %19 = tpu.transpose %17, [1, 0] : vector<16x8xf32> -> vector<8x16xf32>
    %cst_14 = arith.constant dense<0.000000e+00> : vector<16x16xf32>
    %20 = tpu.matmul %16, %19, %cst_14 {dimension_numbers = #tpu.dot_dimension_numbers<[1], [0], [0], [1], [0, 0, 1, 1], [], []>} : vector<16x8xf32>, vector<8x16xf32>, vector<16x16xf32> -> vector<16x16xf32>
    %c0_15 = arith.constant 0 : index
    %c0_16 = arith.constant 0 : index
    %c0_17 = arith.constant 0 : index
    %c0_18 = arith.constant 0 : index
    %21 = vector.load %arg3[%c0_15, %c0_16, %c0_17, %c0_18] : memref<1x4x16x16xf32, #tpu.memory_space<vmem>>, vector<1x1x16x16xf32>
    %22 = vector.shape_cast %21 : vector<1x1x16x16xf32> to vector<16x16xf32>
    %23 = arith.mulf %20, %22 : vector<16x16xf32>
    %cst_19 = arith.constant dense<0xFF800000> : vector<16xf32>
    %24 = vector.multi_reduction <maximumf>, %23, %cst_19 [1] : vector<16x16xf32> to vector<16xf32>
    %25 = vector.shape_cast %24 : vector<16xf32> to vector<16x1xf32>
    %26 = vector.broadcast %25 : vector<16x1xf32> to vector<16x16xf32>
    %27 = arith.subf %23, %26 : vector<16x16xf32>
    %28 = math.exp %27 : vector<16x16xf32>
    %cst_20 = arith.constant dense<0.000000e+00> : vector<16xf32>
    %29 = vector.multi_reduction <add>, %28, %cst_20 [1] : vector<16x16xf32> to vector<16xf32>
    %30 = vector.shape_cast %29 : vector<16xf32> to vector<16x1xf32>
    %31 = tpu.reciprocal %30 {approx = true} : vector<16x1xf32> -> vector<16x1xf32>
    %32 = vector.broadcast %31 : vector<16x1xf32> to vector<16x16xf32>
    %33 = arith.mulf %28, %32 : vector<16x16xf32>
    %cst_21 = arith.constant dense<0.000000e+00> : vector<16x8xf32>
    %34 = tpu.matmul %33, %18, %cst_21 {dimension_numbers = #tpu.dot_dimension_numbers<[1], [0], [0], [1], [0, 0, 1, 1], [], []>} : vector<16x16xf32>, vector<16x8xf32>, vector<16x8xf32> -> vector<16x8xf32>
    %35 = vector.extract_strided_slice %8 {offsets = [0, 8], sizes = [16, 8], strides = [1, 1]} : vector<16x32xf32> to vector<16x8xf32>
    %36 = vector.extract_strided_slice %14 {offsets = [0, 8], sizes = [16, 8], strides = [1, 1]} : vector<16x32xf32> to vector<16x8xf32>
    %37 = vector.extract_strided_slice %15 {offsets = [0, 8], sizes = [16, 8], strides = [1, 1]} : vector<16x32xf32> to vector<16x8xf32>
    %38 = tpu.transpose %36, [1, 0] : vector<16x8xf32> -> vector<8x16xf32>
    %cst_22 = arith.constant dense<0.000000e+00> : vector<16x16xf32>
    %39 = tpu.matmul %35, %38, %cst_22 {dimension_numbers = #tpu.dot_dimension_numbers<[1], [0], [0], [1], [0, 0, 1, 1], [], []>} : vector<16x8xf32>, vector<8x16xf32>, vector<16x16xf32> -> vector<16x16xf32>
    %c0_23 = arith.constant 0 : index
    %c1 = arith.constant 1 : index
    %c0_24 = arith.constant 0 : index
    %c0_25 = arith.constant 0 : index
    %40 = vector.load %arg3[%c0_23, %c1, %c0_24, %c0_25] : memref<1x4x16x16xf32, #tpu.memory_space<vmem>>, vector<1x1x16x16xf32>
    %41 = vector.shape_cast %40 : vector<1x1x16x16xf32> to vector<16x16xf32>
    %42 = arith.mulf %39, %41 : vector<16x16xf32>
    %cst_26 = arith.constant dense<0xFF800000> : vector<16xf32>
    %43 = vector.multi_reduction <maximumf>, %42, %cst_26 [1] : vector<16x16xf32> to vector<16xf32>
    %44 = vector.shape_cast %43 : vector<16xf32> to vector<16x1xf32>
    %45 = vector.broadcast %44 : vector<16x1xf32> to vector<16x16xf32>
    %46 = arith.subf %42, %45 : vector<16x16xf32>
    %47 = math.exp %46 : vector<16x16xf32>
    %cst_27 = arith.constant dense<0.000000e+00> : vector<16xf32>
    %48 = vector.multi_reduction <add>, %47, %cst_27 [1] : vector<16x16xf32> to vector<16xf32>
    %49 = vector.shape_cast %48 : vector<16xf32> to vector<16x1xf32>
    %50 = tpu.reciprocal %49 {approx = true} : vector<16x1xf32> -> vector<16x1xf32>
    %51 = vector.broadcast %50 : vector<16x1xf32> to vector<16x16xf32>
    %52 = arith.mulf %47, %51 : vector<16x16xf32>
    %cst_28 = arith.constant dense<0.000000e+00> : vector<16x8xf32>
    %53 = tpu.matmul %52, %37, %cst_28 {dimension_numbers = #tpu.dot_dimension_numbers<[1], [0], [0], [1], [0, 0, 1, 1], [], []>} : vector<16x16xf32>, vector<16x8xf32>, vector<16x8xf32> -> vector<16x8xf32>
    %54 = vector.extract_strided_slice %8 {offsets = [0, 16], sizes = [16, 8], strides = [1, 1]} : vector<16x32xf32> to vector<16x8xf32>
    %55 = vector.extract_strided_slice %14 {offsets = [0, 16], sizes = [16, 8], strides = [1, 1]} : vector<16x32xf32> to vector<16x8xf32>
    %56 = vector.extract_strided_slice %15 {offsets = [0, 16], sizes = [16, 8], strides = [1, 1]} : vector<16x32xf32> to vector<16x8xf32>
    %57 = tpu.transpose %55, [1, 0] : vector<16x8xf32> -> vector<8x16xf32>
    %cst_29 = arith.constant dense<0.000000e+00> : vector<16x16xf32>
    %58 = tpu.matmul %54, %57, %cst_29 {dimension_numbers = #tpu.dot_dimension_numbers<[1], [0], [0], [1], [0, 0, 1, 1], [], []>} : vector<16x8xf32>, vector<8x16xf32>, vector<16x16xf32> -> vector<16x16xf32>
    %c0_30 = arith.constant 0 : index
    %c2 = arith.constant 2 : index
    %c0_31 = arith.constant 0 : index
    %c0_32 = arith.constant 0 : index
    %59 = vector.load %arg3[%c0_30, %c2, %c0_31, %c0_32] : memref<1x4x16x16xf32, #tpu.memory_space<vmem>>, vector<1x1x16x16xf32>
    %60 = vector.shape_cast %59 : vector<1x1x16x16xf32> to vector<16x16xf32>
    %61 = arith.mulf %58, %60 : vector<16x16xf32>
    %cst_33 = arith.constant dense<0xFF800000> : vector<16xf32>
    %62 = vector.multi_reduction <maximumf>, %61, %cst_33 [1] : vector<16x16xf32> to vector<16xf32>
    %63 = vector.shape_cast %62 : vector<16xf32> to vector<16x1xf32>
    %64 = vector.broadcast %63 : vector<16x1xf32> to vector<16x16xf32>
    %65 = arith.subf %61, %64 : vector<16x16xf32>
    %66 = math.exp %65 : vector<16x16xf32>
    %cst_34 = arith.constant dense<0.000000e+00> : vector<16xf32>
    %67 = vector.multi_reduction <add>, %66, %cst_34 [1] : vector<16x16xf32> to vector<16xf32>
    %68 = vector.shape_cast %67 : vector<16xf32> to vector<16x1xf32>
    %69 = tpu.reciprocal %68 {approx = true} : vector<16x1xf32> -> vector<16x1xf32>
    %70 = vector.broadcast %69 : vector<16x1xf32> to vector<16x16xf32>
    %71 = arith.mulf %66, %70 : vector<16x16xf32>
    %cst_35 = arith.constant dense<0.000000e+00> : vector<16x8xf32>
    %72 = tpu.matmul %71, %56, %cst_35 {dimension_numbers = #tpu.dot_dimension_numbers<[1], [0], [0], [1], [0, 0, 1, 1], [], []>} : vector<16x16xf32>, vector<16x8xf32>, vector<16x8xf32> -> vector<16x8xf32>
    %73 = vector.extract_strided_slice %8 {offsets = [0, 24], sizes = [16, 8], strides = [1, 1]} : vector<16x32xf32> to vector<16x8xf32>
    %74 = vector.extract_strided_slice %14 {offsets = [0, 24], sizes = [16, 8], strides = [1, 1]} : vector<16x32xf32> to vector<16x8xf32>
    %75 = vector.extract_strided_slice %15 {offsets = [0, 24], sizes = [16, 8], strides = [1, 1]} : vector<16x32xf32> to vector<16x8xf32>
    %76 = tpu.transpose %74, [1, 0] : vector<16x8xf32> -> vector<8x16xf32>
    %cst_36 = arith.constant dense<0.000000e+00> : vector<16x16xf32>
    %77 = tpu.matmul %73, %76, %cst_36 {dimension_numbers = #tpu.dot_dimension_numbers<[1], [0], [0], [1], [0, 0, 1, 1], [], []>} : vector<16x8xf32>, vector<8x16xf32>, vector<16x16xf32> -> vector<16x16xf32>
    %c0_37 = arith.constant 0 : index
    %c3 = arith.constant 3 : index
    %c0_38 = arith.constant 0 : index
    %c0_39 = arith.constant 0 : index
    %78 = vector.load %arg3[%c0_37, %c3, %c0_38, %c0_39] : memref<1x4x16x16xf32, #tpu.memory_space<vmem>>, vector<1x1x16x16xf32>
    %79 = vector.shape_cast %78 : vector<1x1x16x16xf32> to vector<16x16xf32>
    %80 = arith.mulf %77, %79 : vector<16x16xf32>
    %cst_40 = arith.constant dense<0xFF800000> : vector<16xf32>
    %81 = vector.multi_reduction <maximumf>, %80, %cst_40 [1] : vector<16x16xf32> to vector<16xf32>
    %82 = vector.shape_cast %81 : vector<16xf32> to vector<16x1xf32>
    %83 = vector.broadcast %82 : vector<16x1xf32> to vector<16x16xf32>
    %84 = arith.subf %80, %83 : vector<16x16xf32>
    %85 = math.exp %84 : vector<16x16xf32>
    %cst_41 = arith.constant dense<0.000000e+00> : vector<16xf32>
    %86 = vector.multi_reduction <add>, %85, %cst_41 [1] : vector<16x16xf32> to vector<16xf32>
    %87 = vector.shape_cast %86 : vector<16xf32> to vector<16x1xf32>
    %88 = tpu.reciprocal %87 {approx = true} : vector<16x1xf32> -> vector<16x1xf32>
    %89 = vector.broadcast %88 : vector<16x1xf32> to vector<16x16xf32>
    %90 = arith.mulf %85, %89 : vector<16x16xf32>
    %cst_42 = arith.constant dense<0.000000e+00> : vector<16x8xf32>
    %91 = tpu.matmul %90, %75, %cst_42 {dimension_numbers = #tpu.dot_dimension_numbers<[1], [0], [0], [1], [0, 0, 1, 1], [], []>} : vector<16x16xf32>, vector<16x8xf32>, vector<16x8xf32> -> vector<16x8xf32>
    %92 = tpu.concatenate %34, %53, %72, %91 in 1 : vector<16x8xf32>, vector<16x8xf32>, vector<16x8xf32>, vector<16x8xf32> -> vector<16x32xf32>
    %c0_43 = arith.constant 0 : index
    %c0_44 = arith.constant 0 : index
    %93 = vector.load %arg8[%c0_43, %c0_44] : memref<32x32xf32, #tpu.memory_space<vmem>>, vector<32x32xf32>
    %cst_45 = arith.constant dense<0.000000e+00> : vector<16x32xf32>
    %94 = tpu.matmul %92, %93, %cst_45 {dimension_numbers = #tpu.dot_dimension_numbers<[1], [0], [0], [1], [0, 0, 1, 1], [], []>} : vector<16x32xf32>, vector<32x32xf32>, vector<16x32xf32> -> vector<16x32xf32>
    %c0_46 = arith.constant 0 : index
    %c0_47 = arith.constant 0 : index
    %95 = vector.load %arg9[%c0_46, %c0_47] : memref<1x32xf32, #tpu.memory_space<vmem>>, vector<1x32xf32>
    %96 = vector.broadcast %95 : vector<1x32xf32> to vector<16x32xf32>
    %97 = arith.addf %94, %96 : vector<16x32xf32>
    %98 = arith.addf %1, %97 : vector<16x32xf32>
    %c0_48 = arith.constant 0 : index
    %c0_49 = arith.constant 0 : index
    %99 = vector.load %arg10[%c0_48, %c0_49] : memref<1x32xf32, #tpu.memory_space<vmem>>, vector<1x32xf32>
    %c0_50 = arith.constant 0 : index
    %c0_51 = arith.constant 0 : index
    %100 = vector.load %arg11[%c0_50, %c0_51] : memref<1x32xf32, #tpu.memory_space<vmem>>, vector<1x32xf32>
    %cst_52 = arith.constant dense<0.000000e+00> : vector<16xf32>
    %101 = vector.multi_reduction <add>, %98, %cst_52 [1] : vector<16x32xf32> to vector<16xf32>
    %102 = vector.shape_cast %101 : vector<16xf32> to vector<16x1xf32>
    %cst_53 = arith.constant 3.200000e+01 : f32
    %103 = vector.broadcast %cst_53 : f32 to vector<16x1xf32>
    %104 = arith.divf %102, %103 : vector<16x1xf32>
    %105 = vector.broadcast %104 : vector<16x1xf32> to vector<16x32xf32>
    %106 = arith.subf %98, %105 : vector<16x32xf32>
    %107 = arith.mulf %106, %106 : vector<16x32xf32>
    %cst_54 = arith.constant dense<0.000000e+00> : vector<16xf32>
    %108 = vector.multi_reduction <add>, %107, %cst_54 [1] : vector<16x32xf32> to vector<16xf32>
    %109 = vector.shape_cast %108 : vector<16xf32> to vector<16x1xf32>
    %cst_55 = arith.constant 3.200000e+01 : f32
    %110 = vector.broadcast %cst_55 : f32 to vector<16x1xf32>
    %111 = arith.divf %109, %110 : vector<16x1xf32>
    %112 = vector.broadcast %104 : vector<16x1xf32> to vector<16x32xf32>
    %113 = arith.subf %98, %112 : vector<16x32xf32>
    %cst_56 = arith.constant 9.99999974E-6 : f32
    %114 = vector.broadcast %cst_56 : f32 to vector<16x1xf32>
    %115 = arith.addf %111, %114 : vector<16x1xf32>
    %116 = math.rsqrt %115 : vector<16x1xf32>
    %117 = vector.broadcast %116 : vector<16x1xf32> to vector<16x32xf32>
    %118 = arith.mulf %113, %117 : vector<16x32xf32>
    %119 = vector.broadcast %99 : vector<1x32xf32> to vector<16x32xf32>
    %120 = arith.mulf %118, %119 : vector<16x32xf32>
    %121 = vector.broadcast %100 : vector<1x32xf32> to vector<16x32xf32>
    %122 = arith.addf %120, %121 : vector<16x32xf32>
    %c0_57 = arith.constant 0 : index
    %c0_58 = arith.constant 0 : index
    %c0_59 = arith.constant 0 : index
    %123 = vector.load %arg12[%c0_57, %c0_58, %c0_59] : memref<1x16x32xf32, #tpu.memory_space<vmem>>, vector<1x16x32xf32>
    %124 = vector.shape_cast %123 : vector<1x16x32xf32> to vector<16x32xf32>
    %125 = vector.shape_cast %122 : vector<16x32xf32> to vector<1x16x32xf32>
    tpu.vector_store %arg12[%c0_57, %c0_58, %c0_59], %125 {strides = array<i32>} : memref<1x16x32xf32, #tpu.memory_space<vmem>>, vector<1x16x32xf32>,
    return
  }
  func.func @transform_0(%arg0: i32) -> (i32, i32, i32) {
    %c0_i32 = arith.constant 0 : i32
    %c0_i32_0 = arith.constant 0 : i32
    %c0_i32_1 = arith.constant 0 : i32
    return %arg0, %c0_i32, %c0_i32_0 : i32, i32, i32
  }
  func.func @transform_1(%arg0: i32) -> (i32, i32, i32) {
    %c0_i32 = arith.constant 0 : i32
    %c0_i32_0 = arith.constant 0 : i32
    %c0_i32_1 = arith.constant 0 : i32
    return %arg0, %c0_i32, %c0_i32_0 : i32, i32, i32
  }
  func.func @transform_2(%arg0: i32) -> (i32, i32, i32, i32) {
    %c0_i32 = arith.constant 0 : i32
    %c0_i32_0 = arith.constant 0 : i32
    %c0_i32_1 = arith.constant 0 : i32
    %c0_i32_2 = arith.constant 0 : i32
    return %arg0, %c0_i32, %c0_i32_0, %c0_i32_1 : i32, i32, i32, i32
  }
  func.func @transform_3(%arg0: i32) -> (i32, i32) {
    %c0_i32 = arith.constant 0 : i32
    %c0_i32_0 = arith.constant 0 : i32
    %c0_i32_1 = arith.constant 0 : i32
    return %c0_i32, %c0_i32_0 : i32, i32
  }
  func.func @transform_4(%arg0: i32) -> (i32, i32) {
    %c0_i32 = arith.constant 0 : i32
    %c0_i32_0 = arith.constant 0 : i32
    %c0_i32_1 = arith.constant 0 : i32
    return %c0_i32, %c0_i32_0 : i32, i32
  }
  func.func @transform_5(%arg0: i32) -> (i32, i32) {
    %c0_i32 = arith.constant 0 : i32
    %c0_i32_0 = arith.constant 0 : i32
    %c0_i32_1 = arith.constant 0 : i32
    return %c0_i32, %c0_i32_0 : i32, i32
  }
  func.func @transform_6(%arg0: i32) -> (i32, i32) {
    %c0_i32 = arith.constant 0 : i32
    %c0_i32_0 = arith.constant 0 : i32
    %c0_i32_1 = arith.constant 0 : i32
    return %c0_i32, %c0_i32_0 : i32, i32
  }
  func.func @transform_7(%arg0: i32) -> (i32, i32) {
    %c0_i32 = arith.constant 0 : i32
    %c0_i32_0 = arith.constant 0 : i32
    %c0_i32_1 = arith.constant 0 : i32
    return %c0_i32, %c0_i32_0 : i32, i32
  }
  func.func @transform_8(%arg0: i32) -> (i32, i32) {
    %c0_i32 = arith.constant 0 : i32
    %c0_i32_0 = arith.constant 0 : i32
    %c0_i32_1 = arith.constant 0 : i32
    return %c0_i32, %c0_i32_0 : i32, i32
  }
  func.func @transform_9(%arg0: i32) -> (i32, i32) {
    %c0_i32 = arith.constant 0 : i32
    %c0_i32_0 = arith.constant 0 : i32
    %c0_i32_1 = arith.constant 0 : i32
    return %c0_i32, %c0_i32_0 : i32, i32
  }
  func.func @transform_10(%arg0: i32) -> (i32, i32) {
    %c0_i32 = arith.constant 0 : i32
    %c0_i32_0 = arith.constant 0 : i32
    %c0_i32_1 = arith.constant 0 : i32
    return %c0_i32, %c0_i32_0 : i32, i32
  }
  func.func @transform_11(%arg0: i32) -> (i32, i32, i32) {
    %c0_i32 = arith.constant 0 : i32
    %c0_i32_0 = arith.constant 0 : i32
    %c0_i32_1 = arith.constant 0 : i32
    return %arg0, %c0_i32, %c0_i32_0 : i32, i32, i32
  }
}

module attributes {stable_mosaic.version = 11 : i64} {
  func.func @_fused_ffn_kernel(%arg0: i32, %arg1: memref<1x8x32xf32, #tpu.memory_space<vmem>>, %arg2: memref<32x64xf32, #tpu.memory_space<vmem>>, %arg3: memref<1x64xf32, #tpu.memory_space<vmem>>, %arg4: memref<64x32xf32, #tpu.memory_space<vmem>>, %arg5: memref<1x32xf32, #tpu.memory_space<vmem>>, %arg6: memref<1x32xf32, #tpu.memory_space<vmem>>, %arg7: memref<1x32xf32, #tpu.memory_space<vmem>>, %arg8: memref<1x8x32xf32, #tpu.memory_space<vmem>>) attributes {dimension_semantics = [#tpu.dimension_semantics<parallel>], iteration_bounds = array<i64: 2>, scalar_prefetch = 0 : i64, scratch_operands = 0 : i64, tpu.core_type = #tpu.core_type<tc>, window_params = [{transform_indices = @transform_0, window_bounds = array<i64: 1, 8, 32>}, {pipeline_mode = #tpu.pipeline_mode<synchronous>, transform_indices = @transform_1, window_bounds = array<i64: 32, 64>}, {pipeline_mode = #tpu.pipeline_mode<synchronous>, transform_indices = @transform_2, window_bounds = array<i64: 1, 64>}, {pipeline_mode = #tpu.pipeline_mode<synchronous>, transform_indices = @transform_3, window_bounds = array<i64: 64, 32>}, {pipeline_mode = #tpu.pipeline_mode<synchronous>, transform_indices = @transform_4, window_bounds = array<i64: 1, 32>}, {pipeline_mode = #tpu.pipeline_mode<synchronous>, transform_indices = @transform_5, window_bounds = array<i64: 1, 32>}, {pipeline_mode = #tpu.pipeline_mode<synchronous>, transform_indices = @transform_6, window_bounds = array<i64: 1, 32>}, {transform_indices = @transform_7, window_bounds = array<i64: 1, 8, 32>}]} {
    %c0 = arith.constant 0 : index
    %c0_0 = arith.constant 0 : index
    %c0_1 = arith.constant 0 : index
    %0 = vector.load %arg1[%c0, %c0_0, %c0_1] : memref<1x8x32xf32, #tpu.memory_space<vmem>>, vector<1x8x32xf32>
    %1 = vector.shape_cast %0 : vector<1x8x32xf32> to vector<8x32xf32>
    %c0_2 = arith.constant 0 : index
    %c0_3 = arith.constant 0 : index
    %2 = vector.load %arg2[%c0_2, %c0_3] : memref<32x64xf32, #tpu.memory_space<vmem>>, vector<32x64xf32>
    %cst = arith.constant dense<0.000000e+00> : vector<8x64xf32>
    %3 = tpu.matmul %1, %2, %cst {dimension_numbers = #tpu.dot_dimension_numbers<[1], [0], [0], [1], [0, 0, 1, 1], [], []>} : vector<8x32xf32>, vector<32x64xf32>, vector<8x64xf32> -> vector<8x64xf32>
    %c0_4 = arith.constant 0 : index
    %c0_5 = arith.constant 0 : index
    %4 = vector.load %arg3[%c0_4, %c0_5] : memref<1x64xf32, #tpu.memory_space<vmem>>, vector<1x64xf32>
    %5 = vector.broadcast %4 : vector<1x64xf32> to vector<8x64xf32>
    %6 = arith.addf %3, %5 : vector<8x64xf32>
    %cst_6 = arith.constant 0.000000e+00 : f32
    %7 = vector.broadcast %cst_6 : f32 to vector<8x64xf32>
    %8 = arith.maximumf %6, %7 : vector<8x64xf32>
    %c0_7 = arith.constant 0 : index
    %c0_8 = arith.constant 0 : index
    %9 = vector.load %arg4[%c0_7, %c0_8] : memref<64x32xf32, #tpu.memory_space<vmem>>, vector<64x32xf32>
    %cst_9 = arith.constant dense<0.000000e+00> : vector<8x32xf32>
    %10 = tpu.matmul %8, %9, %cst_9 {dimension_numbers = #tpu.dot_dimension_numbers<[1], [0], [0], [1], [0, 0, 1, 1], [], []>} : vector<8x64xf32>, vector<64x32xf32>, vector<8x32xf32> -> vector<8x32xf32>
    %11 = arith.addf %1, %10 : vector<8x32xf32>
    %c0_10 = arith.constant 0 : index
    %c0_11 = arith.constant 0 : index
    %12 = vector.load %arg5[%c0_10, %c0_11] : memref<1x32xf32, #tpu.memory_space<vmem>>, vector<1x32xf32>
    %13 = vector.broadcast %12 : vector<1x32xf32> to vector<8x32xf32>
    %14 = arith.addf %11, %13 : vector<8x32xf32>
    %c0_12 = arith.constant 0 : index
    %c0_13 = arith.constant 0 : index
    %15 = vector.load %arg6[%c0_12, %c0_13] : memref<1x32xf32, #tpu.memory_space<vmem>>, vector<1x32xf32>
    %c0_14 = arith.constant 0 : index
    %c0_15 = arith.constant 0 : index
    %16 = vector.load %arg7[%c0_14, %c0_15] : memref<1x32xf32, #tpu.memory_space<vmem>>, vector<1x32xf32>
    %cst_16 = arith.constant dense<0.000000e+00> : vector<8xf32>
    %17 = vector.multi_reduction <add>, %14, %cst_16 [1] : vector<8x32xf32> to vector<8xf32>
    %18 = vector.shape_cast %17 : vector<8xf32> to vector<8x1xf32>
    %cst_17 = arith.constant 3.200000e+01 : f32
    %19 = vector.broadcast %cst_17 : f32 to vector<8x1xf32>
    %20 = arith.divf %18, %19 : vector<8x1xf32>
    %21 = vector.broadcast %20 : vector<8x1xf32> to vector<8x32xf32>
    %22 = arith.subf %14, %21 : vector<8x32xf32>
    %23 = arith.mulf %22, %22 : vector<8x32xf32>
    %cst_18 = arith.constant dense<0.000000e+00> : vector<8xf32>
    %24 = vector.multi_reduction <add>, %23, %cst_18 [1] : vector<8x32xf32> to vector<8xf32>
    %25 = vector.shape_cast %24 : vector<8xf32> to vector<8x1xf32>
    %cst_19 = arith.constant 3.200000e+01 : f32
    %26 = vector.broadcast %cst_19 : f32 to vector<8x1xf32>
    %27 = arith.divf %25, %26 : vector<8x1xf32>
    %28 = vector.broadcast %20 : vector<8x1xf32> to vector<8x32xf32>
    %29 = arith.subf %14, %28 : vector<8x32xf32>
    %cst_20 = arith.constant 9.99999974E-6 : f32
    %30 = vector.broadcast %cst_20 : f32 to vector<8x1xf32>
    %31 = arith.addf %27, %30 : vector<8x1xf32>
    %32 = math.rsqrt %31 : vector<8x1xf32>
    %33 = vector.broadcast %32 : vector<8x1xf32> to vector<8x32xf32>
    %34 = arith.mulf %29, %33 : vector<8x32xf32>
    %35 = vector.broadcast %15 : vector<1x32xf32> to vector<8x32xf32>
    %36 = arith.mulf %34, %35 : vector<8x32xf32>
    %37 = vector.broadcast %16 : vector<1x32xf32> to vector<8x32xf32>
    %38 = arith.addf %36, %37 : vector<8x32xf32>
    %c0_21 = arith.constant 0 : index
    %c0_22 = arith.constant 0 : index
    %c0_23 = arith.constant 0 : index
    %39 = vector.load %arg8[%c0_21, %c0_22, %c0_23] : memref<1x8x32xf32, #tpu.memory_space<vmem>>, vector<1x8x32xf32>
    %40 = vector.shape_cast %39 : vector<1x8x32xf32> to vector<8x32xf32>
    %41 = vector.shape_cast %38 : vector<8x32xf32> to vector<1x8x32xf32>
    tpu.vector_store %arg8[%c0_21, %c0_22, %c0_23], %41 {strides = array<i32>} : memref<1x8x32xf32, #tpu.memory_space<vmem>>, vector<1x8x32xf32>,
    return
  }
  func.func @transform_0(%arg0: i32) -> (i32, i32, i32) {
    %c0_i32 = arith.constant 0 : i32
    %c0_i32_0 = arith.constant 0 : i32
    %c0_i32_1 = arith.constant 0 : i32
    return %arg0, %c0_i32, %c0_i32_0 : i32, i32, i32
  }
  func.func @transform_1(%arg0: i32) -> (i32, i32) {
    %c0_i32 = arith.constant 0 : i32
    %c0_i32_0 = arith.constant 0 : i32
    %c0_i32_1 = arith.constant 0 : i32
    return %c0_i32, %c0_i32_0 : i32, i32
  }
  func.func @transform_2(%arg0: i32) -> (i32, i32) {
    %c0_i32 = arith.constant 0 : i32
    %c0_i32_0 = arith.constant 0 : i32
    %c0_i32_1 = arith.constant 0 : i32
    return %c0_i32, %c0_i32_0 : i32, i32
  }
  func.func @transform_3(%arg0: i32) -> (i32, i32) {
    %c0_i32 = arith.constant 0 : i32
    %c0_i32_0 = arith.constant 0 : i32
    %c0_i32_1 = arith.constant 0 : i32
    return %c0_i32, %c0_i32_0 : i32, i32
  }
  func.func @transform_4(%arg0: i32) -> (i32, i32) {
    %c0_i32 = arith.constant 0 : i32
    %c0_i32_0 = arith.constant 0 : i32
    %c0_i32_1 = arith.constant 0 : i32
    return %c0_i32, %c0_i32_0 : i32, i32
  }
  func.func @transform_5(%arg0: i32) -> (i32, i32) {
    %c0_i32 = arith.constant 0 : i32
    %c0_i32_0 = arith.constant 0 : i32
    %c0_i32_1 = arith.constant 0 : i32
    return %c0_i32, %c0_i32_0 : i32, i32
  }
  func.func @transform_6(%arg0: i32) -> (i32, i32) {
    %c0_i32 = arith.constant 0 : i32
    %c0_i32_0 = arith.constant 0 : i32
    %c0_i32_1 = arith.constant 0 : i32
    return %c0_i32, %c0_i32_0 : i32, i32
  }
  func.func @transform_7(%arg0: i32) -> (i32, i32, i32) {
    %c0_i32 = arith.constant 0 : i32
    %c0_i32_0 = arith.constant 0 : i32
    %c0_i32_1 = arith.constant 0 : i32
    return %arg0, %c0_i32, %c0_i32_0 : i32, i32, i32
  }
}

module attributes {stable_mosaic.version = 11 : i64} {
  func.func @_fused_mha_kernel(%arg0: i32, %arg1: memref<1x8x32xf32, #tpu.memory_space<vmem>>, %arg2: memref<1x16x32xf32, #tpu.memory_space<vmem>>, %arg3: memref<32x32xf32, #tpu.memory_space<vmem>>, %arg4: memref<1x32xf32, #tpu.memory_space<vmem>>, %arg5: memref<32x64xf32, #tpu.memory_space<vmem>>, %arg6: memref<1x64xf32, #tpu.memory_space<vmem>>, %arg7: memref<32x32xf32, #tpu.memory_space<vmem>>, %arg8: memref<1x32xf32, #tpu.memory_space<vmem>>, %arg9: memref<1x32xf32, #tpu.memory_space<vmem>>, %arg10: memref<1x32xf32, #tpu.memory_space<vmem>>, %arg11: memref<1x8x32xf32, #tpu.memory_space<vmem>>) attributes {dimension_semantics = [#tpu.dimension_semantics<parallel>], iteration_bounds = array<i64: 2>, scalar_prefetch = 0 : i64, scratch_operands = 0 : i64, tpu.core_type = #tpu.core_type<tc>, window_params = [{transform_indices = @transform_0, window_bounds = array<i64: 1, 8, 32>}, {transform_indices = @transform_1, window_bounds = array<i64: 1, 16, 32>}, {pipeline_mode = #tpu.pipeline_mode<synchronous>, transform_indices = @transform_2, window_bounds = array<i64: 32, 32>}, {pipeline_mode = #tpu.pipeline_mode<synchronous>, transform_indices = @transform_3, window_bounds = array<i64: 1, 32>}, {pipeline_mode = #tpu.pipeline_mode<synchronous>, transform_indices = @transform_4, window_bounds = array<i64: 32, 64>}, {pipeline_mode = #tpu.pipeline_mode<synchronous>, transform_indices = @transform_5, window_bounds = array<i64: 1, 64>}, {pipeline_mode = #tpu.pipeline_mode<synchronous>, transform_indices = @transform_6, window_bounds = array<i64: 32, 32>}, {pipeline_mode = #tpu.pipeline_mode<synchronous>, transform_indices = @transform_7, window_bounds = array<i64: 1, 32>}, {pipeline_mode = #tpu.pipeline_mode<synchronous>, transform_indices = @transform_8, window_bounds = array<i64: 1, 32>}, {pipeline_mode = #tpu.pipeline_mode<synchronous>, transform_indices = @transform_9, window_bounds = array<i64: 1, 32>}, {transform_indices = @transform_10, window_bounds = array<i64: 1, 8, 32>}]} {
    %c0 = arith.constant 0 : index
    %c0_0 = arith.constant 0 : index
    %c0_1 = arith.constant 0 : index
    %0 = vector.load %arg1[%c0, %c0_0, %c0_1] : memref<1x8x32xf32, #tpu.memory_space<vmem>>, vector<1x8x32xf32>
    %1 = vector.shape_cast %0 : vector<1x8x32xf32> to vector<8x32xf32>
    %c0_2 = arith.constant 0 : index
    %c0_3 = arith.constant 0 : index
    %c0_4 = arith.constant 0 : index
    %2 = vector.load %arg2[%c0_2, %c0_3, %c0_4] : memref<1x16x32xf32, #tpu.memory_space<vmem>>, vector<1x16x32xf32>
    %3 = vector.shape_cast %2 : vector<1x16x32xf32> to vector<16x32xf32>
    %c0_5 = arith.constant 0 : index
    %c0_6 = arith.constant 0 : index
    %4 = vector.load %arg3[%c0_5, %c0_6] : memref<32x32xf32, #tpu.memory_space<vmem>>, vector<32x32xf32>
    %cst = arith.constant dense<0.000000e+00> : vector<8x32xf32>
    %5 = tpu.matmul %1, %4, %cst {dimension_numbers = #tpu.dot_dimension_numbers<[1], [0], [0], [1], [0, 0, 1, 1], [], []>} : vector<8x32xf32>, vector<32x32xf32>, vector<8x32xf32> -> vector<8x32xf32>
    %c0_7 = arith.constant 0 : index
    %c0_8 = arith.constant 0 : index
    %6 = vector.load %arg4[%c0_7, %c0_8] : memref<1x32xf32, #tpu.memory_space<vmem>>, vector<1x32xf32>
    %7 = vector.broadcast %6 : vector<1x32xf32> to vector<8x32xf32>
    %8 = arith.addf %5, %7 : vector<8x32xf32>
    %c0_9 = arith.constant 0 : index
    %c0_10 = arith.constant 0 : index
    %9 = vector.load %arg5[%c0_9, %c0_10] : memref<32x64xf32, #tpu.memory_space<vmem>>, vector<32x64xf32>
    %cst_11 = arith.constant dense<0.000000e+00> : vector<16x64xf32>
    %10 = tpu.matmul %3, %9, %cst_11 {dimension_numbers = #tpu.dot_dimension_numbers<[1], [0], [0], [1], [0, 0, 1, 1], [], []>} : vector<16x32xf32>, vector<32x64xf32>, vector<16x64xf32> -> vector<16x64xf32>
    %c0_12 = arith.constant 0 : index
    %c0_13 = arith.constant 0 : index
    %11 = vector.load %arg6[%c0_12, %c0_13] : memref<1x64xf32, #tpu.memory_space<vmem>>, vector<1x64xf32>
    %12 = vector.broadcast %11 : vector<1x64xf32> to vector<16x64xf32>
    %13 = arith.addf %10, %12 : vector<16x64xf32>
    %14 = vector.extract_strided_slice %13 {offsets = [0, 0], sizes = [16, 32], strides = [1, 1]} : vector<16x64xf32> to vector<16x32xf32>
    %15 = vector.extract_strided_slice %13 {offsets = [0, 32], sizes = [16, 32], strides = [1, 1]} : vector<16x64xf32> to vector<16x32xf32>
    %16 = vector.extract_strided_slice %8 {offsets = [0, 0], sizes = [8, 8], strides = [1, 1]} : vector<8x32xf32> to vector<8x8xf32>
    %17 = vector.extract_strided_slice %14 {offsets = [0, 0], sizes = [16, 8], strides = [1, 1]} : vector<16x32xf32> to vector<16x8xf32>
    %18 = vector.extract_strided_slice %15 {offsets = [0, 0], sizes = [16, 8], strides = [1, 1]} : vector<16x32xf32> to vector<16x8xf32>
    %19 = tpu.transpose %17, [1, 0] : vector<16x8xf32> -> vector<8x16xf32>
    %cst_14 = arith.constant dense<0.000000e+00> : vector<8x16xf32>
    %20 = tpu.matmul %16, %19, %cst_14 {dimension_numbers = #tpu.dot_dimension_numbers<[1], [0], [0], [1], [0, 0, 1, 1], [], []>} : vector<8x8xf32>, vector<8x16xf32>, vector<8x16xf32> -> vector<8x16xf32>
    %cst_15 = arith.constant dense<0xFF800000> : vector<8xf32>
    %21 = vector.multi_reduction <maximumf>, %20, %cst_15 [1] : vector<8x16xf32> to vector<8xf32>
    %22 = vector.shape_cast %21 : vector<8xf32> to vector<8x1xf32>
    %23 = vector.broadcast %22 : vector<8x1xf32> to vector<8x16xf32>
    %24 = arith.subf %20, %23 : vector<8x16xf32>
    %25 = math.exp %24 : vector<8x16xf32>
    %cst_16 = arith.constant dense<0.000000e+00> : vector<8xf32>
    %26 = vector.multi_reduction <add>, %25, %cst_16 [1] : vector<8x16xf32> to vector<8xf32>
    %27 = vector.shape_cast %26 : vector<8xf32> to vector<8x1xf32>
    %28 = tpu.reciprocal %27 {approx = true} : vector<8x1xf32> -> vector<8x1xf32>
    %29 = vector.broadcast %28 : vector<8x1xf32> to vector<8x16xf32>
    %30 = arith.mulf %25, %29 : vector<8x16xf32>
    %cst_17 = arith.constant dense<0.000000e+00> : vector<8x8xf32>
    %31 = tpu.matmul %30, %18, %cst_17 {dimension_numbers = #tpu.dot_dimension_numbers<[1], [0], [0], [1], [0, 0, 1, 1], [], []>} : vector<8x16xf32>, vector<16x8xf32>, vector<8x8xf32> -> vector<8x8xf32>
    %32 = vector.extract_strided_slice %8 {offsets = [0, 8], sizes = [8, 8], strides = [1, 1]} : vector<8x32xf32> to vector<8x8xf32>
    %33 = vector.extract_strided_slice %14 {offsets = [0, 8], sizes = [16, 8], strides = [1, 1]} : vector<16x32xf32> to vector<16x8xf32>
    %34 = vector.extract_strided_slice %15 {offsets = [0, 8], sizes = [16, 8], strides = [1, 1]} : vector<16x32xf32> to vector<16x8xf32>
    %35 = tpu.transpose %33, [1, 0] : vector<16x8xf32> -> vector<8x16xf32>
    %cst_18 = arith.constant dense<0.000000e+00> : vector<8x16xf32>
    %36 = tpu.matmul %32, %35, %cst_18 {dimension_numbers = #tpu.dot_dimension_numbers<[1], [0], [0], [1], [0, 0, 1, 1], [], []>} : vector<8x8xf32>, vector<8x16xf32>, vector<8x16xf32> -> vector<8x16xf32>
    %cst_19 = arith.constant dense<0xFF800000> : vector<8xf32>
    %37 = vector.multi_reduction <maximumf>, %36, %cst_19 [1] : vector<8x16xf32> to vector<8xf32>
    %38 = vector.shape_cast %37 : vector<8xf32> to vector<8x1xf32>
    %39 = vector.broadcast %38 : vector<8x1xf32> to vector<8x16xf32>
    %40 = arith.subf %36, %39 : vector<8x16xf32>
    %41 = math.exp %40 : vector<8x16xf32>
    %cst_20 = arith.constant dense<0.000000e+00> : vector<8xf32>
    %42 = vector.multi_reduction <add>, %41, %cst_20 [1] : vector<8x16xf32> to vector<8xf32>
    %43 = vector.shape_cast %42 : vector<8xf32> to vector<8x1xf32>
    %44 = tpu.reciprocal %43 {approx = true} : vector<8x1xf32> -> vector<8x1xf32>
    %45 = vector.broadcast %44 : vector<8x1xf32> to vector<8x16xf32>
    %46 = arith.mulf %41, %45 : vector<8x16xf32>
    %cst_21 = arith.constant dense<0.000000e+00> : vector<8x8xf32>
    %47 = tpu.matmul %46, %34, %cst_21 {dimension_numbers = #tpu.dot_dimension_numbers<[1], [0], [0], [1], [0, 0, 1, 1], [], []>} : vector<8x16xf32>, vector<16x8xf32>, vector<8x8xf32> -> vector<8x8xf32>
    %48 = vector.extract_strided_slice %8 {offsets = [0, 16], sizes = [8, 8], strides = [1, 1]} : vector<8x32xf32> to vector<8x8xf32>
    %49 = vector.extract_strided_slice %14 {offsets = [0, 16], sizes = [16, 8], strides = [1, 1]} : vector<16x32xf32> to vector<16x8xf32>
    %50 = vector.extract_strided_slice %15 {offsets = [0, 16], sizes = [16, 8], strides = [1, 1]} : vector<16x32xf32> to vector<16x8xf32>
    %51 = tpu.transpose %49, [1, 0] : vector<16x8xf32> -> vector<8x16xf32>
    %cst_22 = arith.constant dense<0.000000e+00> : vector<8x16xf32>
    %52 = tpu.matmul %48, %51, %cst_22 {dimension_numbers = #tpu.dot_dimension_numbers<[1], [0], [0], [1], [0, 0, 1, 1], [], []>} : vector<8x8xf32>, vector<8x16xf32>, vector<8x16xf32> -> vector<8x16xf32>
    %cst_23 = arith.constant dense<0xFF800000> : vector<8xf32>
    %53 = vector.multi_reduction <maximumf>, %52, %cst_23 [1] : vector<8x16xf32> to vector<8xf32>
    %54 = vector.shape_cast %53 : vector<8xf32> to vector<8x1xf32>
    %55 = vector.broadcast %54 : vector<8x1xf32> to vector<8x16xf32>
    %56 = arith.subf %52, %55 : vector<8x16xf32>
    %57 = math.exp %56 : vector<8x16xf32>
    %cst_24 = arith.constant dense<0.000000e+00> : vector<8xf32>
    %58 = vector.multi_reduction <add>, %57, %cst_24 [1] : vector<8x16xf32> to vector<8xf32>
    %59 = vector.shape_cast %58 : vector<8xf32> to vector<8x1xf32>
    %60 = tpu.reciprocal %59 {approx = true} : vector<8x1xf32> -> vector<8x1xf32>
    %61 = vector.broadcast %60 : vector<8x1xf32> to vector<8x16xf32>
    %62 = arith.mulf %57, %61 : vector<8x16xf32>
    %cst_25 = arith.constant dense<0.000000e+00> : vector<8x8xf32>
    %63 = tpu.matmul %62, %50, %cst_25 {dimension_numbers = #tpu.dot_dimension_numbers<[1], [0], [0], [1], [0, 0, 1, 1], [], []>} : vector<8x16xf32>, vector<16x8xf32>, vector<8x8xf32> -> vector<8x8xf32>
    %64 = vector.extract_strided_slice %8 {offsets = [0, 24], sizes = [8, 8], strides = [1, 1]} : vector<8x32xf32> to vector<8x8xf32>
    %65 = vector.extract_strided_slice %14 {offsets = [0, 24], sizes = [16, 8], strides = [1, 1]} : vector<16x32xf32> to vector<16x8xf32>
    %66 = vector.extract_strided_slice %15 {offsets = [0, 24], sizes = [16, 8], strides = [1, 1]} : vector<16x32xf32> to vector<16x8xf32>
    %67 = tpu.transpose %65, [1, 0] : vector<16x8xf32> -> vector<8x16xf32>
    %cst_26 = arith.constant dense<0.000000e+00> : vector<8x16xf32>
    %68 = tpu.matmul %64, %67, %cst_26 {dimension_numbers = #tpu.dot_dimension_numbers<[1], [0], [0], [1], [0, 0, 1, 1], [], []>} : vector<8x8xf32>, vector<8x16xf32>, vector<8x16xf32> -> vector<8x16xf32>
    %cst_27 = arith.constant dense<0xFF800000> : vector<8xf32>
    %69 = vector.multi_reduction <maximumf>, %68, %cst_27 [1] : vector<8x16xf32> to vector<8xf32>
    %70 = vector.shape_cast %69 : vector<8xf32> to vector<8x1xf32>
    %71 = vector.broadcast %70 : vector<8x1xf32> to vector<8x16xf32>
    %72 = arith.subf %68, %71 : vector<8x16xf32>
    %73 = math.exp %72 : vector<8x16xf32>
    %cst_28 = arith.constant dense<0.000000e+00> : vector<8xf32>
    %74 = vector.multi_reduction <add>, %73, %cst_28 [1] : vector<8x16xf32> to vector<8xf32>
    %75 = vector.shape_cast %74 : vector<8xf32> to vector<8x1xf32>
    %76 = tpu.reciprocal %75 {approx = true} : vector<8x1xf32> -> vector<8x1xf32>
    %77 = vector.broadcast %76 : vector<8x1xf32> to vector<8x16xf32>
    %78 = arith.mulf %73, %77 : vector<8x16xf32>
    %cst_29 = arith.constant dense<0.000000e+00> : vector<8x8xf32>
    %79 = tpu.matmul %78, %66, %cst_29 {dimension_numbers = #tpu.dot_dimension_numbers<[1], [0], [0], [1], [0, 0, 1, 1], [], []>} : vector<8x16xf32>, vector<16x8xf32>, vector<8x8xf32> -> vector<8x8xf32>
    %80 = tpu.concatenate %31, %47, %63, %79 in 1 : vector<8x8xf32>, vector<8x8xf32>, vector<8x8xf32>, vector<8x8xf32> -> vector<8x32xf32>
    %c0_30 = arith.constant 0 : index
    %c0_31 = arith.constant 0 : index
    %81 = vector.load %arg7[%c0_30, %c0_31] : memref<32x32xf32, #tpu.memory_space<vmem>>, vector<32x32xf32>
    %cst_32 = arith.constant dense<0.000000e+00> : vector<8x32xf32>
    %82 = tpu.matmul %80, %81, %cst_32 {dimension_numbers = #tpu.dot_dimension_numbers<[1], [0], [0], [1], [0, 0, 1, 1], [], []>} : vector<8x32xf32>, vector<32x32xf32>, vector<8x32xf32> -> vector<8x32xf32>
    %c0_33 = arith.constant 0 : index
    %c0_34 = arith.constant 0 : index
    %83 = vector.load %arg8[%c0_33, %c0_34] : memref<1x32xf32, #tpu.memory_space<vmem>>, vector<1x32xf32>
    %84 = vector.broadcast %83 : vector<1x32xf32> to vector<8x32xf32>
    %85 = arith.addf %82, %84 : vector<8x32xf32>
    %86 = arith.addf %1, %85 : vector<8x32xf32>
    %c0_35 = arith.constant 0 : index
    %c0_36 = arith.constant 0 : index
    %87 = vector.load %arg9[%c0_35, %c0_36] : memref<1x32xf32, #tpu.memory_space<vmem>>, vector<1x32xf32>
    %c0_37 = arith.constant 0 : index
    %c0_38 = arith.constant 0 : index
    %88 = vector.load %arg10[%c0_37, %c0_38] : memref<1x32xf32, #tpu.memory_space<vmem>>, vector<1x32xf32>
    %cst_39 = arith.constant dense<0.000000e+00> : vector<8xf32>
    %89 = vector.multi_reduction <add>, %86, %cst_39 [1] : vector<8x32xf32> to vector<8xf32>
    %90 = vector.shape_cast %89 : vector<8xf32> to vector<8x1xf32>
    %cst_40 = arith.constant 3.200000e+01 : f32
    %91 = vector.broadcast %cst_40 : f32 to vector<8x1xf32>
    %92 = arith.divf %90, %91 : vector<8x1xf32>
    %93 = vector.broadcast %92 : vector<8x1xf32> to vector<8x32xf32>
    %94 = arith.subf %86, %93 : vector<8x32xf32>
    %95 = arith.mulf %94, %94 : vector<8x32xf32>
    %cst_41 = arith.constant dense<0.000000e+00> : vector<8xf32>
    %96 = vector.multi_reduction <add>, %95, %cst_41 [1] : vector<8x32xf32> to vector<8xf32>
    %97 = vector.shape_cast %96 : vector<8xf32> to vector<8x1xf32>
    %cst_42 = arith.constant 3.200000e+01 : f32
    %98 = vector.broadcast %cst_42 : f32 to vector<8x1xf32>
    %99 = arith.divf %97, %98 : vector<8x1xf32>
    %100 = vector.broadcast %92 : vector<8x1xf32> to vector<8x32xf32>
    %101 = arith.subf %86, %100 : vector<8x32xf32>
    %cst_43 = arith.constant 9.99999974E-6 : f32
    %102 = vector.broadcast %cst_43 : f32 to vector<8x1xf32>
    %103 = arith.addf %99, %102 : vector<8x1xf32>
    %104 = math.rsqrt %103 : vector<8x1xf32>
    %105 = vector.broadcast %104 : vector<8x1xf32> to vector<8x32xf32>
    %106 = arith.mulf %101, %105 : vector<8x32xf32>
    %107 = vector.broadcast %87 : vector<1x32xf32> to vector<8x32xf32>
    %108 = arith.mulf %106, %107 : vector<8x32xf32>
    %109 = vector.broadcast %88 : vector<1x32xf32> to vector<8x32xf32>
    %110 = arith.addf %108, %109 : vector<8x32xf32>
    %c0_44 = arith.constant 0 : index
    %c0_45 = arith.constant 0 : index
    %c0_46 = arith.constant 0 : index
    %111 = vector.load %arg11[%c0_44, %c0_45, %c0_46] : memref<1x8x32xf32, #tpu.memory_space<vmem>>, vector<1x8x32xf32>
    %112 = vector.shape_cast %111 : vector<1x8x32xf32> to vector<8x32xf32>
    %113 = vector.shape_cast %110 : vector<8x32xf32> to vector<1x8x32xf32>
    tpu.vector_store %arg11[%c0_44, %c0_45, %c0_46], %113 {strides = array<i32>} : memref<1x8x32xf32, #tpu.memory_space<vmem>>, vector<1x8x32xf32>,
    return
  }
  func.func @transform_0(%arg0: i32) -> (i32, i32, i32) {
    %c0_i32 = arith.constant 0 : i32
    %c0_i32_0 = arith.constant 0 : i32
    %c0_i32_1 = arith.constant 0 : i32
    return %arg0, %c0_i32, %c0_i32_0 : i32, i32, i32
  }
  func.func @transform_1(%arg0: i32) -> (i32, i32, i32) {
    %c0_i32 = arith.constant 0 : i32
    %c0_i32_0 = arith.constant 0 : i32
    %c0_i32_1 = arith.constant 0 : i32
    return %arg0, %c0_i32, %c0_i32_0 : i32, i32, i32
  }
  func.func @transform_2(%arg0: i32) -> (i32, i32) {
    %c0_i32 = arith.constant 0 : i32
    %c0_i32_0 = arith.constant 0 : i32
    %c0_i32_1 = arith.constant 0 : i32
    return %c0_i32, %c0_i32_0 : i32, i32
  }
  func.func @transform_3(%arg0: i32) -> (i32, i32) {
    %c0_i32 = arith.constant 0 : i32
    %c0_i32_0 = arith.constant 0 : i32
    %c0_i32_1 = arith.constant 0 : i32
    return %c0_i32, %c0_i32_0 : i32, i32
  }
  func.func @transform_4(%arg0: i32) -> (i32, i32) {
    %c0_i32 = arith.constant 0 : i32
    %c0_i32_0 = arith.constant 0 : i32
    %c0_i32_1 = arith.constant 0 : i32
    return %c0_i32, %c0_i32_0 : i32, i32
  }
  func.func @transform_5(%arg0: i32) -> (i32, i32) {
    %c0_i32 = arith.constant 0 : i32
    %c0_i32_0 = arith.constant 0 : i32
    %c0_i32_1 = arith.constant 0 : i32
    return %c0_i32, %c0_i32_0 : i32, i32
  }
  func.func @transform_6(%arg0: i32) -> (i32, i32) {
    %c0_i32 = arith.constant 0 : i32
    %c0_i32_0 = arith.constant 0 : i32
    %c0_i32_1 = arith.constant 0 : i32
    return %c0_i32, %c0_i32_0 : i32, i32
  }
  func.func @transform_7(%arg0: i32) -> (i32, i32) {
    %c0_i32 = arith.constant 0 : i32
    %c0_i32_0 = arith.constant 0 : i32
    %c0_i32_1 = arith.constant 0 : i32
    return %c0_i32, %c0_i32_0 : i32, i32
  }
  func.func @transform_8(%arg0: i32) -> (i32, i32) {
    %c0_i32 = arith.constant 0 : i32
    %c0_i32_0 = arith.constant 0 : i32
    %c0_i32_1 = arith.constant 0 : i32
    return %c0_i32, %c0_i32_0 : i32, i32
  }
  func.func @transform_9(%arg0: i32) -> (i32, i32) {
    %c0_i32 = arith.constant 0 : i32
    %c0_i32_0 = arith.constant 0 : i32
    %c0_i32_1 = arith.constant 0 : i32
    return %c0_i32, %c0_i32_0 : i32, i32
  }
  func.func @transform_10(%arg0: i32) -> (i32, i32, i32) {
    %c0_i32 = arith.constant 0 : i32
    %c0_i32_0 = arith.constant 0 : i32
    %c0_i32_1 = arith.constant 0 : i32
    return %arg0, %c0_i32, %c0_i32_0 : i32, i32, i32
  }
}

</mosaic_0001>

<bundles_post_ra>
// kernel: encoder_layer.7
= control target key start
LH: loop header
LB: loop body
LE: loop exit
PB: predicated region body
PF: predicated region fallthrough
CT: control target
= control target key end

     0   :  { %12 = vsyncpa [#allocation3], 0  ;;  %s905_s0 = inlined_call_operand.vmem [shape: f32[2,8,32], index: 0, kind: input, shape index: {}]   ;;  %s906_s1 = inlined_call_operand.vmem [shape: f32[32,64], index: 1, kind: input, shape index: {}]   ;;  %s907_s2 = inlined_call_operand.vmem [shape: f32[1,64], index: 2, kind: input, shape index: {}]   ;;  %s908_s3 = inlined_call_operand.vmem [shape: f32[64,32], index: 3, kind: input, shape index: {}]   ;;  %s909_s4 = inlined_call_operand.vmem [shape: f32[1,32], index: 4, kind: input, shape index: {}]   ;;  %s910_s5 = inlined_call_operand.vmem [shape: f32[1,32], index: 5, kind: input, shape index: {}]   ;;  %s911_s6 = inlined_call_operand.vmem [shape: f32[1,32], index: 6, kind: input, shape index: {}]   ;;  %s912_s7 = inlined_call_operand.hbm [shape: f32[2,8,32], index: 7, kind: output, shape index: {}]  }
   0x1   :  { %14 = vsyncpa [#allocation3 + $0x1], 0  ;;  %s764_s24 = smov 0   ;;  %s766_s25 = smov 0  }
   0x2   :  { %s768_s26 = smov 0   ;;  %s770_s27 = smov 0  }
   0x3 LB: > { %s785_s28 = sadd.s32 4294967295, %s719_s27   ;;  %s556_s29 = sadd.s32 4294967294, %s719_s27   ;;  %s719_s27 = sphi %s770_s27, %s918_s27   ;;  %s715_s26 = sphi %s768_s26, %s917_s26   ;;  %s711_s25 = sphi %s766_s25, %s916_s25   ;;  %s707_s24 = sphi %s764_s24, %s915_s24  }
   0x4   : > { %s789_s30 = sadd.s32 1, %s719_s27   ;;  %s179_s8 = sadd.s32 1, %s715_s26 }
   0x5   : > { %s176_s9 = ssub.s32 %s719_s27, %s789_s30  ;;  %p189_p0 = scmp.ne.s32.totalorder %s715_s26, %s711_s25 }
   0x6   : > { %p177_p1 = scmp.eq.s32.totalorder %s176_s9, 0  ;;  %p190_p2 = scmp.eq.s32.totalorder %s785_s28, 1 }
   0x7   : > { %p195_p3 = scmp.ne.s32.totalorder %s711_s25, %s707_s24  ;;  %p196_p4 = scmp.eq.s32.totalorder %s556_s29, 1 }
   0x8   : > { %s800_s10 = scalar_select %p177_p1, %s715_s26, %s179_s8  }
   0x9   : > { %p802_p5 = por %p190_p2, %p189_p0  ;;  %p806_p6 = por %p196_p4, %p195_p3 }
   0xa   : > { %p559_p7 = scmp.ge.s32.totalorder %s719_s27, 1  ;;  %p239_p8 = scmp.lt.s32.totalorder %s719_s27, 3 }
   0xc   : > { %p240_p9 = pnand %p559_p7, %p239_p8 }
   0xd   : > { %p270_p10 = scmp.lt.s32.totalorder (!%p240_p9), %s785_s28, 1  ;;  %s267_s18 = sand.u32 (!%p240_p9), 1, %s711_s25  }
   0xe   : > { %243 = sbr.rel (%p240_p9) target bundleno = 743 (0x2e7), region = 48  ;;  %s484_s16 = scalar_lea.sflag (!%p240_p9), [#allocation3], %s267_s18 }
   0xf   : > { %s723_s20 = smov (!%p240_p9), [#allocation2]  }
  0x10   : > { %s663_s21 = sshll.u32 (!%p240_p9), %s723_s20, 4  ;;  %s664_s21 = int_to_ptr.vmem [resolvable:$false] %s663_s21 }
  0x13   : > { %v278_v0 = vld [vmem:[%s906_s1 + $0x18] sm:$0xff]  ;;  %v721_v1 = vmov 0.0   ;;  %v277_v2 = vld [vmem:[%s906_s1 + $0x10] sm:$0xff]  ;;  %vm722_vm0 = vmmov 0   ;;  %s271_s19 = scalar_select %p270_p10, %s785_s28, 1  ;;  %v276_v5 = vld [vmem:[%s906_s1 + $0x8] sm:$0xff] }
  0x14   : > { %586 = vmatprep.subr.mxu0 %v721_v1  ;;  %594 = vmatprep.mubr.msk.f32.mxu0 %vm722_vm0, %v721_v1  ;;  %v368_v3 = vld [vmem:[%s908_s3 + $0x38] sm:$0xff]  ;;  %v367_v4 = vld [vmem:[%s908_s3 + $0x30] sm:$0xff]  ;;  %v366_v6 = vld [vmem:[%s908_s3 + $0x28] sm:$0xff]  ;;  %vm286_vm1 = vcmask 261120   ;;  %vm369_vm2 = vcmask 523264  }
  0x15   : > { %587 = vmatpush3.msra.mxu0 %v278_v0  ;;  %597 = vmatprep.subr.mxu1 %v721_v1  ;;  %s561_s29 = sshll.u32 %s271_s19, 3  ;;  %v275_v7 = vld [vmem:[%s906_s1] sm:$0xff]  ;;  %v364_v10 = vld [vmem:[%s908_s3 + $0x18] sm:$0xff]  ;;  %v363_v11 = vld [vmem:[%s908_s3 + $0x10] sm:$0xff]  ;;  %s560_s19 = sshll.u32 %s267_s18, 3 }
  0x16   : > { %588 = vmatprep.subr.mxu0 %v721_v1  ;;  %598 = vmatpush3.msra.mxu1 %v368_v3  ;;  %s273_s17 = scalar_lea.vmem %s905_s0, %s561_s29  ;;  %v365_v9 = vld [vmem:[%s908_s3 + $0x20] sm:$0xff]  ;;  %v362_v12 = vld [vmem:[%s908_s3 + $0x8] sm:$0xff]  ;;  %s569_s29 = sshll.u32 %s785_s28, 7 }
  0x17   : > { %589 = vmatpush3.msra.mxu0 %v277_v2  ;;  %599 = vmatprep.subr.mxu1 %v721_v1  ;;  %v274_v8 = vld [vmem:[%s273_s17] sm:$0xff]  ;;  %s269_s8 = scalar_lea.vmem [#allocation2], %s560_s19  ;;  %s495_s15 = scalar_lea.hbm %s912_s7, %s569_s29 }
  0x18   : > { %590 = vmatprep.subr.mxu0 %v721_v1  ;;  %600 = vmatpush3.msra.mxu1 %v367_v4  ;;  %v361_v13 = vld [vmem:[%s908_s3] sm:$0xff]  ;;  %s497_s9 = sshll.u32 %s269_s8, 4  ;;  %s665_s28 = scalar_lea.vmem %s664_s21, 256  ;;  %s498_s9 = int_to_ptr.vmem [resolvable:$true] %s497_s9 }
  0x19   : > { %591 = vmatpush3.msra.mxu0 %v276_v5  ;;  %601 = vmatprep.subr.mxu1 %v721_v1  ;;  %v562_v14 = vld [vmem:[%s907_s2] ss:$0 sm:$0xff]  ;;  %s659_s17 = scalar_lea.vmem %s498_s9, 128  ;;  %p666_p0 = scmp.lt.s32.totalorder %s498_s9, %s664_s21 }
  0x1a   : > { %592 = vmatprep.subr.mxu0 %v721_v1  ;;  %602 = vmatpush3.msra.mxu1 %v366_v6  ;;  %v565_v20 = vld [vmem:[%s909_s4] ss:$0 sm:$0xff]  ;;  %p660_p11 = scmp.ne.s32.totalorder %s498_s9, %s659_s17  ;;  %p667_p1 = scmp.lt.s32.totalorder %s665_s28, %s659_s17 }
  0x1b   : > { %593 = vmatpush3.msra.mxu0 %v275_v7  ;;  %603 = vmatprep.subr.mxu1 %v721_v1  ;;  %v566_v34 = vld [vmem:[%s910_s5] ss:$0 sm:$0xff] }
  0x1c   : > { %595 = vmatmul.mubr.msk.f32.vlgmr.msra.gmra.mxu0 %vm286_vm1, %v274_v8  ;;  %604 = vmatpush3.msra.mxu1 %v365_v9  ;;  %v567_v36 = vld [vmem:[%s911_s6] ss:$0 sm:$0xff]  ;;  %p661_p12 = pnand %p660_p11, %p802_p5  ;;  %p668_p2 = por %p667_p1, %p666_p0 }
  0x1d   : > { %605 = vmatprep.subr.mxu1 %v721_v1  ;;  %613 = vmatprep.mubr.msk.f32.mxu1 %vm722_vm0, %v721_v1 }
  0x1e   : > { %606 = vmatpush3.msra.mxu1 %v364_v10  ;;  %p662_p13 = pneg %p661_p12 }
  0x1f   : > { %607 = vmatprep.subr.mxu1 %v721_v1 }
  0x20   : > { %608 = vmatpush3.msra.mxu1 %v363_v11  ;;  %p669_p3 = pnand %p668_p2, %p662_p13 }
  0x21   : > { %609 = vmatprep.subr.mxu1 %v721_v1 }
  0x22   : > { %610 = vmatpush3.msra.mxu1 %v362_v12 }
  0x23   : > { %611 = vmatprep.subr.mxu1 %v721_v1 }
  0x24   : > { %612 = vmatpush3.msra.mxu1 %v361_v13 }
  0xdc   : > { %v356_v15 = vpop.f32.mrf.mxu0 }
  0xdd   : > { %v357_v16 = vadd.f32 %v562_v14, %v356_v15 }
  0xde   : > { %v596_v17 = vpop.f32.mrf.mxu0 }
  0xdf   : > { %v360_v18 = vmax.f32 %v357_v16, 0.0 }
  0xe1   : > { %614 = vmatmul.mubr.msk.f32.vlgmr.msra.gmra.mxu1 %vm369_vm2, %v360_v18 }
 0x1a1   : > { %v439_v19 = vpop.f32.mrf.mxu1 }
 0x1a2   : > { %v443_v21 = vadd.f32 %v439_v19, %v274_v8 }
 0x1a3   : > { %v615_v22 = vpop.f32.mrf.mxu1 }
 0x1a4   : > { %v451_v23 = vadd.f32 %v565_v20, %v443_v21 }
 0x1a6   : > { %v454_v24 = vsel %vm286_vm1, %v451_v23, 0.0 }
 0x1a7   : > { %455 = vadd.xlane.f32.xlu0 %v454_v24 }
 0x230   : > { %v456_v25 = vpop.xlane.xlu0 %455 }
 0x231   : > { %v458_v26 = vmul.f32 0.03125, %v456_v25 }
 0x233   : > { %v459_v27 = vsub.f32 %v451_v23, %v458_v26 }
 0x235   : > { %v460_v28 = vmul.f32 %v459_v27, %v459_v27 }
 0x237   : > { %v461_v29 = vsel %vm286_vm1, %v460_v28, 0.0 }
 0x238   : > { %462 = vadd.xlane.f32.xlu0 %v461_v29 }
 0x2c1   : > { %v463_v30 = vpop.xlane.xlu0 %462 }
 0x2c2   : > { %v464_v31 = vmul.f32 0.03125, %v463_v30 }
 0x2c4   : > { %v465_v32 = vadd.f32 1e-05, %v464_v31 }
 0x2c6   : > { %657 = vrsqrt.f32 %v465_v32 }
 0x2d3   : > { %v658_v33 = vpop.eup %657 }
 0x2d4   : > { %v467_v35 = vmul.f32 %v658_v33, %v459_v27 }
 0x2d6   : > { %v474_v37 = vmul.f32 %v566_v34, %v467_v35 }
 0x2d8   : > { %v481_v38 = vadd.f32 %v567_v36, %v474_v37 }
 0x2da   : > { %482 = vst.msk [vmem:[%s269_s8] sm:$0xff] %vm286_vm1, %v481_v38 }
 0x2db   : > { %672 = shalt.err (!%p669_p3)
}
 0x2dc   : > { %s673_s19 = scalar_lea.hbm %s495_s15, 128  ;;  %s677_s23 = scalar_lea.hbm %s912_s7, 256 }
 0x2dd   : > { %p674_p4 = scmp.ne.s32.totalorder %s495_s15, %s673_s19  ;;  %p678_p9 = scmp.lt.s32.totalorder %s495_s15, %s912_s7 }
 0x2de   : > { %p679_p10 = scmp.lt.s32.totalorder %s677_s23, %s673_s19 }
 0x2df   : > { %p675_p7 = pnand %p674_p4, %p802_p5 }
 0x2e0   : > { %p680_p11 = por %p679_p10, %p678_p9 }
 0x2e1   : > { %p676_p8 = pneg %p675_p7 }
 0x2e3   : > { %p681_p12 = pnand %p680_p11, %p676_p8 }
 0x2e5   : > { %684 = shalt.err (!%p681_p12)
}
 0x2e6   : > { %616 = dma.vmem_to_hbm [thread:$0]  (%p802_p5), %s498_s9, 128, %s495_s15, %s484_s16  }
 0x2e7 PF: > { %p622_p13 = scmp.ge.s32.totalorder %s719_s27, 2  ;;  %s509_s13 = sand.u32 1, %s707_s24  }
 0x2e8   : > { %s510_s14 = scalar_lea.sflag [#allocation3], %s509_s13 }
 0x2e9   : > { %p619_p0 = pnand %p622_p13, %p806_p6 }
 0x2eb   : > { %p620_p1 = pneg %p619_p0 }
 0x2ed   : > { %702 = dma.done.wait (%p620_p1), %s510_s14, 128  }
 0x2ee   : > { %704 = vsyncadd (%p620_p1), %s510_s14, 4294967168  ;;  %p17_p2 = scmp.ge.s32.totalorder %s789_s30, 4   ;;  %s915_s24 = smov %s711_s25 }
 0x2ef   : > { %s916_s25 = smov %s715_s26  ;;  %s917_s26 = smov %s800_s10 }
 0x2f0   : > { %s918_s27 = smov %s789_s30  ;;  %19 = sbr.rel (!%p17_p2) target bundleno = 3 (0x3), region = 83 }
 0x2f5   :  { %515 = vsyncpa [#allocation3], 1 }
 0x2f6   :  { %517 = vsyncpa [#allocation3 + $0x1], 1 }

// kernel: encoder_layer.6
= control target key start
LH: loop header
LB: loop body
LE: loop exit
PB: predicated region body
PF: predicated region fallthrough
CT: control target
= control target key end

     0   :  { %12 = vsyncpa [#allocation3], 0  ;;  %s974_s0 = inlined_call_operand.vmem [shape: f32[2,16,32], index: 0, kind: input, shape index: {}]   ;;  %s975_s1 = inlined_call_operand.vmem [shape: f32[32,64], index: 1, kind: input, shape index: {}]   ;;  %s976_s2 = inlined_call_operand.vmem [shape: f32[1,64], index: 2, kind: input, shape index: {}]   ;;  %s977_s3 = inlined_call_operand.vmem [shape: f32[64,32], index: 3, kind: input, shape index: {}]   ;;  %s978_s4 = inlined_call_operand.vmem [shape: f32[1,32], index: 4, kind: input, shape index: {}]   ;;  %s979_s5 = inlined_call_operand.vmem [shape: f32[1,32], index: 5, kind: input, shape index: {}]   ;;  %s980_s6 = inlined_call_operand.vmem [shape: f32[1,32], index: 6, kind: input, shape index: {}]   ;;  %s981_s7 = inlined_call_operand.hbm [shape: f32[2,16,32], index: 7, kind: output, shape index: {}]  }
   0x1   :  { %14 = vsyncpa [#allocation3 + $0x1], 0  ;;  %s816_s24 = smov 0   ;;  %s818_s25 = smov 0  }
   0x2   :  { %s820_s26 = smov 0   ;;  %s822_s27 = smov 0  }
   0x3 LB: > { %s837_s28 = sadd.s32 4294967295, %s771_s27   ;;  %s598_s29 = sadd.s32 4294967294, %s771_s27   ;;  %s771_s27 = sphi %s822_s27, %s987_s27   ;;  %s767_s26 = sphi %s820_s26, %s986_s26   ;;  %s763_s25 = sphi %s818_s25, %s985_s25   ;;  %s759_s24 = sphi %s816_s24, %s984_s24  }
   0x4   : > { %s841_s30 = sadd.s32 1, %s771_s27   ;;  %s179_s8 = sadd.s32 1, %s767_s26 }
   0x5   : > { %s176_s9 = ssub.s32 %s771_s27, %s841_s30  ;;  %p189_p0 = scmp.ne.s32.totalorder %s767_s26, %s763_s25 }
   0x6   : > { %p177_p1 = scmp.eq.s32.totalorder %s176_s9, 0  ;;  %p190_p2 = scmp.eq.s32.totalorder %s837_s28, 1 }
   0x7   : > { %p195_p3 = scmp.ne.s32.totalorder %s763_s25, %s759_s24  ;;  %p196_p4 = scmp.eq.s32.totalorder %s598_s29, 1 }
   0x8   : > { %s852_s10 = scalar_select %p177_p1, %s767_s26, %s179_s8  }
   0x9   : > { %p854_p5 = por %p190_p2, %p189_p0  ;;  %p858_p6 = por %p196_p4, %p195_p3 }
   0xa   : > { %p601_p7 = scmp.ge.s32.totalorder %s771_s27, 1  ;;  %p240_p8 = scmp.lt.s32.totalorder %s771_s27, 3 }
   0xc   : > { %p241_p9 = pnand %p601_p7, %p240_p8 }
   0xd   : > { %p272_p10 = scmp.lt.s32.totalorder (!%p241_p9), %s837_s28, 1  ;;  %s269_s18 = sand.u32 (!%p241_p9), 1, %s763_s25  }
   0xe   : > { %244 = sbr.rel (%p241_p9) target bundleno = 753 (0x2f1), region = 48  ;;  %s602_s21 = sshll.u32 (!%p241_p9), %s269_s18, 4 }
   0xf   : > { %s619_s29 = sshll.u32 (!%p241_p9), %s837_s28, 8  ;;  %s271_s8 = scalar_lea.vmem (!%p241_p9), [#allocation2], %s602_s21 }
  0x10   : > { %s536_s9 = sshll.u32 (!%p241_p9), %s271_s8, 4  ;;  %s929_s15 = scalar_lea.hbm (!%p241_p9), %s981_s7, %s619_s29  ;;  %s931_s9 = int_to_ptr.vmem [resolvable:$true] %s536_s9 }
  0x11   : > { %s934_s16 = scalar_lea.sflag (!%p241_p9), [#allocation3], %s269_s18 }
  0x13   : > { %v282_v0 = vld [vmem:[%s975_s1 + $0x18] sm:$0xff]  ;;  %v281_v1 = vld [vmem:[%s975_s1 + $0x10] sm:$0xff]  ;;  %v280_v4 = vld [vmem:[%s975_s1 + $0x8] sm:$0xff]  ;;  %s273_s23 = scalar_select %p272_p10, %s837_s28, 1  ;;  %vm290_vm0 = vcmask 261120   ;;  %vm382_vm1 = vcmask 523264  }
  0x14   : > { %636 = vmatprep.subr.mxu0 %v282_v0  ;;  %v381_v2 = vld [vmem:[%s977_s3 + $0x38] sm:$0xff]  ;;  %v380_v3 = vld [vmem:[%s977_s3 + $0x30] sm:$0xff]  ;;  %v379_v5 = vld [vmem:[%s977_s3 + $0x28] sm:$0xff]  ;;  %s711_s28 = scalar_lea.vmem %s931_s9, 256 }
  0x15   : > { %637 = vmatpush3.msra.mxu0 %v282_v0  ;;  %647 = vmatprep.subr.mxu1 %v381_v2  ;;  %v279_v6 = vld [vmem:[%s975_s1] sm:$0xff]  ;;  %s618_s14 = sshll.u32 %s273_s23, 4  ;;  %v377_v10 = vld [vmem:[%s977_s3 + $0x18] sm:$0xff]  ;;  %v376_v11 = vld [vmem:[%s977_s3 + $0x10] sm:$0xff]  ;;  %p712_p11 = scmp.ne.s32.totalorder %s931_s9, %s711_s28 }
  0x16   : > { %638 = vmatprep.subr.mxu0 %v281_v1  ;;  %648 = vmatpush3.msra.mxu1 %v381_v2  ;;  %s276_s17 = scalar_lea.vmem %s974_s0, %s618_s14  ;;  %v378_v9 = vld [vmem:[%s977_s3 + $0x20] sm:$0xff]  ;;  %v375_v12 = vld [vmem:[%s977_s3 + $0x8] sm:$0xff] }
  0x17   : > { %639 = vmatpush3.msra.mxu0 %v281_v1  ;;  %649 = vmatprep.subr.mxu1 %v380_v3  ;;  %v277_v7 = vld [vmem:[%s276_s17] sm:$0xff]  ;;  %v278_v8 = vld [vmem:[%s276_s17 + $0x8] sm:$0xff]  ;;  %p713_p12 = pnand %p712_p11, %p854_p5  ;;  %s773_s17 = smov [#allocation2]  }
  0x18   : > { %640 = vmatprep.subr.mxu0 %v280_v4  ;;  %650 = vmatpush3.msra.mxu1 %v380_v3  ;;  %v374_v13 = vld [vmem:[%s977_s3] sm:$0xff]  ;;  %s715_s19 = sshll.u32 %s773_s17, 4  ;;  %s716_s19 = int_to_ptr.vmem [resolvable:$false] %s715_s19 }
  0x19   : > { %641 = vmatpush3.msra.mxu0 %v280_v4  ;;  %651 = vmatprep.subr.mxu1 %v379_v5  ;;  %v605_v14 = vld [vmem:[%s976_s2] ss:$0 sm:$0xff]  ;;  %p714_p13 = pneg %p713_p12  ;;  %s717_s20 = scalar_lea.vmem %s716_s19, 512 }
  0x1a   : > { %642 = vmatprep.subr.mxu0 %v279_v6  ;;  %644 = vmatprep.mubr.msk.f32.mxu0 %vm290_vm0, %v277_v7  ;;  %v610_v25 = vld [vmem:[%s978_s4] ss:$0 sm:$0xff]  ;;  %p718_p0 = scmp.lt.s32.totalorder %s931_s9, %s716_s19  ;;  %p719_p1 = scmp.lt.s32.totalorder %s717_s20, %s711_s28 }
  0x1b   : > { %643 = vmatpush3.msra.mxu0 %v279_v6  ;;  %652 = vmatpush3.msra.mxu1 %v379_v5  ;;  %v611_v47 = vld [vmem:[%s979_s5] ss:$0 sm:$0xff] }
  0x1c   : > { %645 = vmatmul.mubr.msk.f32.vlgmr.msra.gmra.mxu0 %vm290_vm0, %v278_v8  ;;  %653 = vmatprep.subr.mxu1 %v378_v9  ;;  %v612_v49 = vld [vmem:[%s980_s6] ss:$0 sm:$0xff]  ;;  %p720_p2 = por %p719_p1, %p718_p0 }
  0x1d   : > { %654 = vmatpush3.msra.mxu1 %v378_v9 }
  0x1e   : > { %655 = vmatprep.subr.mxu1 %v377_v10  ;;  %p721_p3 = pnand %p720_p2, %p714_p13 }
  0x1f   : > { %656 = vmatpush3.msra.mxu1 %v377_v10 }
  0x20   : > { %657 = vmatprep.subr.mxu1 %v376_v11 }
  0x21   : > { %658 = vmatpush3.msra.mxu1 %v376_v11 }
  0x22   : > { %659 = vmatprep.subr.mxu1 %v375_v12 }
  0x23   : > { %660 = vmatpush3.msra.mxu1 %v375_v12 }
  0x24   : > { %661 = vmatprep.subr.mxu1 %v374_v13 }
  0x25   : > { %662 = vmatpush3.msra.mxu1 %v374_v13 }
  0xdc   : > { %v646_v15 = vpop.f32.mrf.mxu0 }
  0xdd   : > { %v369_v16 = vadd.f32 %v646_v15, %v605_v14 }
  0xde   : > { %v363_v17 = vpop.f32.mrf.mxu0 }
  0xdf   : > { %v364_v18 = vadd.f32 %v605_v14, %v363_v17  ;;  %v373_v20 = vmax.f32 %v369_v16, 0.0 }
  0xe1   : > { %v372_v19 = vmax.f32 %v364_v18, 0.0 }
  0xe3   : > { %663 = vmatprep.mubr.msk.f32.mxu1 %vm382_vm1, %v372_v19 }
  0xe4   : > { %664 = vmatmul.mubr.msk.f32.vlgmr.msra.gmra.mxu1 %vm382_vm1, %v373_v20 }
 0x1a4   : > { %v665_v21 = vpop.f32.mrf.mxu1 }
 0x1a5   : > { %v465_v23 = vadd.f32 %v665_v21, %v278_v8 }
 0x1a6   : > { %v455_v22 = vpop.f32.mrf.mxu1 }
 0x1a7   : > { %v464_v24 = vadd.f32 %v455_v22, %v277_v7  ;;  %v474_v28 = vadd.f32 %v610_v25, %v465_v23 }
 0x1a9   : > { %v473_v26 = vadd.f32 %v610_v25, %v464_v24  ;;  %v480_v29 = vsel %vm290_vm0, %v474_v28, 0.0 }
 0x1ab   : > { %v477_v27 = vsel %vm290_vm0, %v473_v26, 0.0 }
 0x1ac   : > { %478 = vadd.xlane.f32.xlu0 %v477_v27 }
 0x1b0   : > { %481 = vadd.xlane.f32.xlu0 %v480_v29 }
 0x235   : > { %v479_v30 = vpop.xlane.xlu0 %478 }
 0x236   : > { %v484_v31 = vmul.f32 0.03125, %v479_v30 }
 0x238   : > { %v486_v32 = vsub.f32 %v473_v26, %v484_v31 }
 0x239   : > { %v482_v33 = vpop.xlane.xlu0 %481 }
 0x23a   : > { %v485_v34 = vmul.f32 0.03125, %v482_v33  ;;  %v488_v35 = vmul.f32 %v486_v32, %v486_v32 }
 0x23c   : > { %v487_v36 = vsub.f32 %v474_v28, %v485_v34  ;;  %v490_v37 = vsel %vm290_vm0, %v488_v35, 0.0 }
 0x23d   : > { %491 = vadd.xlane.f32.xlu1 %v490_v37 }
 0x23e   : > { %v489_v38 = vmul.f32 %v487_v36, %v487_v36 }
 0x240   : > { %v493_v39 = vsel %vm290_vm0, %v489_v38, 0.0 }
 0x241   : > { %494 = vadd.xlane.f32.xlu1 %v493_v39 }
 0x2c6   : > { %v492_v40 = vpop.xlane.xlu1 %491 }
 0x2c7   : > { %v496_v41 = vmul.f32 0.03125, %v492_v40 }
 0x2c9   : > { %v498_v42 = vadd.f32 1e-05, %v496_v41 }
 0x2ca   : > { %v495_v43 = vpop.xlane.xlu1 %494 }
 0x2cb   : > { %707 = vrsqrt.f32 %v498_v42  ;;  %v497_v44 = vmul.f32 0.03125, %v495_v43 }
 0x2cd   : > { %v499_v45 = vadd.f32 1e-05, %v497_v44 }
 0x2cf   : > { %709 = vrsqrt.f32 %v499_v45 }
 0x2d8   : > { %v708_v46 = vpop.eup %707 }
 0x2d9   : > { %v502_v48 = vmul.f32 %v708_v46, %v486_v32 }
 0x2db   : > { %v510_v50 = vmul.f32 %v611_v47, %v502_v48 }
 0x2dc   : > { %v710_v51 = vpop.eup %709 }
 0x2dd   : > { %v503_v52 = vmul.f32 %v710_v51, %v487_v36  ;;  %v518_v53 = vadd.f32 %v612_v49, %v510_v50 }
 0x2df   : > { %v511_v54 = vmul.f32 %v611_v47, %v503_v52  ;;  %520 = vst.msk [vmem:[%s271_s8] sm:$0xff] %vm290_vm0, %v518_v53 }
 0x2e1   : > { %v519_v55 = vadd.f32 %v612_v49, %v511_v54 }
 0x2e3   : > { %521 = vst.msk [vmem:[%s271_s8 + $0x8] sm:$0xff] %vm290_vm0, %v519_v55 }
 0x2e4   : > { %724 = shalt.err (!%p721_p3)
}
 0x2e5   : > { %s725_s18 = scalar_lea.hbm %s929_s15, 256  ;;  %s729_s23 = scalar_lea.hbm %s981_s7, 512 }
 0x2e6   : > { %p726_p4 = scmp.ne.s32.totalorder %s929_s15, %s725_s18  ;;  %p730_p9 = scmp.lt.s32.totalorder %s929_s15, %s981_s7 }
 0x2e7   : > { %p731_p10 = scmp.lt.s32.totalorder %s729_s23, %s725_s18 }
 0x2e8   : > { %p727_p7 = pnand %p726_p4, %p854_p5 }
 0x2e9   : > { %p732_p11 = por %p731_p10, %p730_p9 }
 0x2ea   : > { %p728_p8 = pneg %p727_p7 }
 0x2ec   : > { %p733_p12 = pnand %p732_p11, %p728_p8 }
 0x2ee   : > { %736 = shalt.err (!%p733_p12)
}
 0x2ef   : > { %s774_s13 = smov 128   ;;  %s775_s14 = smov 8  }
 0x2f0   : > { %666 = dma.vmem_to_hbm [thread:$0]  (%p854_p5), %s931_s9, 256, %s929_s15, %s934_s16, %s774_s13, %s774_s13, %s775_s14  }
 0x2f1 PF: > { %p672_p13 = scmp.ge.s32.totalorder %s771_s27, 2  ;;  %s551_s28 = sand.u32 1, %s759_s24  }
 0x2f2   : > { %s552_s17 = scalar_lea.sflag [#allocation3], %s551_s28 }
 0x2f3   : > { %p669_p0 = pnand %p672_p13, %p858_p6 }
 0x2f5   : > { %p670_p1 = pneg %p669_p0 }
 0x2f7   : > { %754 = dma.done.wait (%p670_p1), %s552_s17, 256  }
 0x2f8   : > { %756 = vsyncadd (%p670_p1), %s552_s17, 4294967040  ;;  %p17_p2 = scmp.ge.s32.totalorder %s841_s30, 4   ;;  %s984_s24 = smov %s763_s25 }
 0x2f9   : > { %s985_s25 = smov %s767_s26  ;;  %s986_s26 = smov %s852_s10 }
 0x2fa   : > { %s987_s27 = smov %s841_s30  ;;  %19 = sbr.rel (!%p17_p2) target bundleno = 3 (0x3), region = 83 }
 0x2ff   :  { %557 = vsyncpa [#allocation3], 1 }
 0x300   :  { %559 = vsyncpa [#allocation3 + $0x1], 1 }

// kernel: encoder_layer.5
= control target key start
LH: loop header
LB: loop body
LE: loop exit
PB: predicated region body
PF: predicated region fallthrough
CT: control target
= control target key end

     0   :  { %s1718_s13 = smov 0   ;;  %s1912_s0 = inlined_call_operand.vmem [shape: f32[2,8,32], index: 0, kind: input, shape index: {}]   ;;  %s1913_s1 = inlined_call_operand.vmem [shape: f32[2,16,32], index: 1, kind: input, shape index: {}]   ;;  %s1914_s2 = inlined_call_operand.vmem [shape: f32[32,32], index: 2, kind: input, shape index: {}]   ;;  %s1915_s3 = inlined_call_operand.vmem [shape: f32[1,32], index: 3, kind: input, shape index: {}]   ;;  %s1916_s4 = inlined_call_operand.vmem [shape: f32[32,64], index: 4, kind: input, shape index: {}]   ;;  %s1917_s5 = inlined_call_operand.vmem [shape: f32[1,64], index: 5, kind: input, shape index: {}]   ;;  %s1918_s6 = inlined_call_operand.vmem [shape: f32[32,32], index: 6, kind: input, shape index: {}]   ;;  %s1919_s7 = inlined_call_operand.vmem [shape: f32[1,32], index: 7, kind: input, shape index: {}]   ;;  %s1920_s8 = inlined_call_operand.vmem [shape: f32[1,32], index: 8, kind: input, shape index: {}]   ;;  %s1921_s9 = inlined_call_operand.vmem [shape: f32[1,32], index: 9, kind: input, shape index: {}]   ;;  %s1922_s10 = inlined_call_operand.vmem [shape: f32[2,8,32], index: 10, kind: output, shape index: {}]  }
   0x1 LB: > { %s1439_s14 = sadd.s32 4294967295, %s1649_s13   ;;  %p1443_p0 = scmp.ge.s32.totalorder %s1649_s13, 1  ;;  %s1649_s13 = sphi %s1718_s13, %s20_s13  }
   0x2   : > { %p321_p1 = scmp.lt.s32.totalorder %s1649_s13, 3 }
   0x4   : > { %p322_p2 = pnand %p1443_p0, %p321_p1 }
   0x5   : > { %p362_p3 = scmp.lt.s32.totalorder (!%p322_p2), %s1439_s14, 1  ;;  %s1653_s23 = smov (!%p322_p2), 96  }
   0x6   : > { %325 = sbr.rel (%p322_p2) target bundleno = 2572 (0xa0c), region = 60  ;;  %s1654_s26 = smov (!%p322_p2), 120  }
   0x7   : > { %s1655_s27 = smov (!%p322_p2), 112   ;;  %s1656_s28 = smov (!%p322_p2), 88  }
   0x8   : > { %s1658_s11 = smov (!%p322_p2), 104   ;;  %s1659_s12 = smov (!%p322_p2), 72  }
   0x9   : > { %s1661_s16 = smov (!%p322_p2), 16   ;;  %s1662_s25 = smov (!%p322_p2), 24  }
   0xb   : > { %v466_v0 = vld [vmem:[%s1916_s4 + $0x18] sm:$0xff]  ;;  %v465_v1 = vld [vmem:[%s1916_s4 + $0x10] sm:$0xff]  ;;  %v1651_v2 = vmov 0.0   ;;  %v464_v5 = vld [vmem:[%s1916_s4 + $0x8] sm:$0xff]  ;;  %s1924_s14 = smov (!%p362_p3, %s1439_s14), 1  ;;  %vm389_vm0 = vcmask 261120  }
   0xc   : > { %1527 = vmatprep.subr.mxu1 %v466_v0  ;;  %1516 = vmatprep.subr.mxu0 %v1651_v2  ;;  %v381_v3 = vld [vmem:[%s1914_s2 + $0x18] sm:$0xff]  ;;  %v380_v4 = vld [vmem:[%s1914_s2 + $0x10] sm:$0xff]  ;;  %v379_v6 = vld [vmem:[%s1914_s2 + $0x8] sm:$0xff]  ;;  %s1475_s29 = sshll.u32 %s1924_s14, 4  ;;  %s1444_s30 = sshll.u32 %s1924_s14, 3  ;;  %vm1652_vm1 = vmmov 0  }
   0xd   : > { %1528 = vmatpush3.msra.mxu1 %v466_v0  ;;  %1517 = vmatpush3.msra.mxu0 %v381_v3  ;;  %v463_v7 = vld [vmem:[%s1916_s4] sm:$0xff]  ;;  %s370_s15 = scalar_lea.vmem %s1913_s1, %s1475_s29  ;;  %s365_s18 = scalar_lea.vmem %s1912_s0, %s1444_s30  ;;  %vm555_vm2 = vcmask 64512   ;;  %vm635_vm3 = vcmask 130048   ;;  %vm1256_vm4 = vcmask 195584  }
   0xe   : > { %1529 = vmatprep.subr.mxu1 %v465_v1  ;;  %1518 = vmatprep.subr.mxu0 %v1651_v2  ;;  %v376_v8 = vld [vmem:[%s370_s15] sm:$0xff]  ;;  %v377_v9 = vld [vmem:[%s370_s15 + $0x8] sm:$0xff]  ;;  %s1657_s29 = smov 80   ;;  %s1660_s15 = smov 8  }
   0xf   : > { %1530 = vmatpush3.msra.mxu1 %v465_v1  ;;  %1519 = vmatpush3.msra.mxu0 %v380_v4  ;;  %v378_v10 = vld [vmem:[%s1914_s2] sm:$0xff]  ;;  %s374_s17 = scalar_lea.vmem %s1922_s10, %s1444_s30 }
  0x10   : > { %1531 = vmatprep.subr.mxu1 %v464_v5  ;;  %1520 = vmatprep.subr.mxu0 %v1651_v2  ;;  %v1767_v11 = vld [vmem:[%s365_s18] sm:$0xff] }
  0x11   : > { %1532 = vmatpush3.msra.mxu1 %v464_v5  ;;  %1521 = vmatpush3.msra.mxu0 %v379_v6  ;;  %v1450_v12 = vld [vmem:[%s1917_s5] ss:$0 sm:$0xff] }
  0x12   : > { %1533 = vmatprep.subr.mxu1 %v463_v7  ;;  %1535 = vmatprep.mubr.msk.f32.mxu1 %vm389_vm0, %v376_v8  ;;  %v1448_v17 = vld [vmem:[%s1915_s3] ss:$0 sm:$0xff] }
  0x13   : > { %1534 = vmatpush3.msra.mxu1 %v463_v7  ;;  %1522 = vmatprep.subr.mxu0 %v1651_v2 }
  0x14   : > { %1536 = vmatmul.mubr.msk.f32.vlgmr.msra.gmra.mxu1 %vm389_vm0, %v377_v9  ;;  %1523 = vmatpush3.msra.mxu0 %v378_v10 }
  0x15   : > { %1524 = vmatprep.mubr.msk.f32.mxu0 %vm1652_vm1, %v1651_v2  ;;  %1538 = vmatprep.subr.mxu0 %v1651_v2 }
  0x16   : > { %1525 = vmatmul.mubr.msk.f32.vlgmr.msra.gmra.mxu0 %vm389_vm0, %v1767_v11  ;;  %1545 = vmatprep.subr.mxu1 %v1651_v2 }
  0x17   : > { %1542 = vmatprep.mubr.msk.f32.mxu0 %vm1652_vm1, %v1651_v2  ;;  %1549 = vmatprep.mubr.msk.f32.mxu1 %vm1652_vm1, %v1651_v2 }
  0xd4   : > { %v1537_v13 = vpop.f32.mrf.mxu1 }
  0xd5   : > { %v1783_v14 = vadd.f32 %v1537_v13, %v1450_v12 }
  0xd6   : > { %v546_v15 = vpop.f32.mrf.mxu1  ;;  %v459_v16 = vpop.f32.mrf.mxu0 }
  0xd7   : > { %649 = vrot.lane.b32.xlu1 %v1783_v14, %s1653_s23  ;;  %1539 = vmatpush3.xpose.msk.msra.mxu0 %vm555_vm2, %v1783_v14  ;;  %v1792_v19 = vadd.f32 %v1450_v12, %v546_v15  ;;  %v1794_v20 = vadd.f32 %v1448_v17, %v459_v16 }
  0xd8   : > { %1540 = vmatprep.subr.mxu0 %v1651_v2  ;;  %v1526_v18 = vpop.f32.mrf.mxu0 }
  0xdb   : > { %647 = vrot.lane.b32.xlu1 %v1792_v19, %s1653_s23  ;;  %1541 = vmatpush3.xpose.msk.msra.mxu0 %vm555_vm2, %v1792_v19 }
  0xdc   : > { %1566 = vmatprep.subr.mxu0 %v1651_v2 }
  0xde   : > { %1543 = vmatmul.mubr.msk.f32.vlgmr.msra.gmra.mxu0 %vm555_vm2, %v1794_v20 }
  0xdf   : > { %728 = vrot.lane.b32.xlu1 %v1792_v19, %s1654_s26  ;;  %1570 = vmatprep.mubr.msk.f32.mxu0 %vm1652_vm1, %v1651_v2 }
  0xe3   : > { %902 = vrot.lane.b32.xlu1 %v1783_v14, %s1655_s27 }
  0xe7   : > { %726 = vrot.lane.b32.xlu1 %v1794_v20, %s1654_s26 }
  0xeb   : > { %900 = vrot.lane.b32.xlu1 %v1792_v19, %s1655_s27 }
  0xef   : > { %898 = vrot.lane.b32.xlu1 %v1794_v20, %s1655_s27 }
 0x149   : > { %v650_v21 = vpop.permute.xlu1 %649 }
 0x14a   : > { %1546 = vmatpush3.msra.mxu1 %v650_v21 }
 0x14b   : > { %1547 = vmatprep.subr.mxu1 %v1651_v2 }
 0x14d   : > { %v648_v22 = vpop.permute.xlu1 %647 }
 0x14e   : > { %1548 = vmatpush3.msra.mxu1 %v648_v22 }
 0x14f   : > { %1552 = vmatprep.subr.mxu1 %v1651_v2 }
 0x151   : > { %v729_v23 = vpop.permute.xlu1 %728 }
 0x155   : > { %v903_v24 = vpop.permute.xlu1 %902 }
 0x156   : > { %1567 = vmatpush3.xpose.msk.msra.mxu0 %vm555_vm2, %v903_v24 }
 0x157   : > { %1568 = vmatprep.subr.mxu0 %v1651_v2 }
 0x159   : > { %v727_v25 = vpop.permute.xlu1 %726 }
 0x15d   : > { %v901_v26 = vpop.permute.xlu1 %900 }
 0x15e   : > { %1569 = vmatpush3.xpose.msk.msra.mxu0 %vm555_vm2, %v901_v26 }
 0x15f   : > { %1587 = vmatprep.subr.mxu0 %v1651_v2 }
 0x161   : > { %v899_v27 = vpop.permute.xlu1 %898 }
 0x162   : > { %1571 = vmatmul.mubr.msk.f32.vlgmr.msra.gmra.mxu0 %vm555_vm2, %v899_v27  ;;  %v1261_v27 = vld [vmem:[%s1918_s6 + $0x18] sm:$0xff] }
 0x163   : > { %1591 = vmatprep.mubr.msk.f32.mxu0 %vm1652_vm1, %v1651_v2 }
 0x19e   : > { %v631_v28 = vpop.f32.mrf.mxu0 }
 0x19f   : > { %v636_v29 = vsel %vm635_vm3, %v631_v28, -inf }
 0x1a0   : > { %637 = vmax.xlane.f32.xlu0 %v636_v29  ;;  %v1544_v30 = vpop.f32.mrf.mxu0  ;;  %v1258_v29 = vld [vmem:[%s1918_s6] sm:$0xff] }
 0x222   : > { %v976_v31 = vpop.f32.mrf.mxu0 }
 0x223   : > { %v980_v38 = vsel %vm635_vm3, %v976_v31, -inf }
 0x224   : > { %v1572_v32 = vpop.f32.mrf.mxu0 }
 0x229   : > { %v638_v33 = vpop.xlane.xlu0 %637 }
 0x22a   : > { %v639_v34 = vsub.f32 %v631_v28, %v638_v33  ;;  %v1259_v28 = vld [vmem:[%s1918_s6 + $0x8] sm:$0xff] }
 0x22c   : > { %v640_v35 = vmul.f32 1.442695, %v639_v34 }
 0x22e   : > { %1625 = vpow2.f32 %v640_v35 }
 0x23b   : > { %v1626_v36 = vpop.eup %1625 }
 0x23c   : > { %v642_v37 = vsel %vm635_vm3, %v1626_v36, 0.0 }
 0x23d   : > { %643 = vadd.xlane.f32.xlu0 %v642_v37 }
 0x253   : > { %730 = vrot.lane.b32.xlu0 %v1783_v14, %s1654_s26 }
 0x272   : > { %981 = vmax.xlane.f32.xlu0 %v980_v38 }
 0x288   : > { %821 = vrot.lane.b32.xlu0 %v1783_v14, %s1656_s28 }
 0x2c6   : > { %v644_v39 = vpop.xlane.xlu0 %643 }
 0x2c7   : > { %1627 = vrcp.f32 %v644_v39 }
 0x2ca   : > { %v731_v42 = vpop.permute.xlu0 %730 }
 0x2d4   : > { %v1628_v40 = vpop.eup %1627 }
 0x2d5   : > { %v646_v41 = vmul.f32 %v1628_v40, %v1626_v36 }
 0x2d7   : > { %1550 = vmatmul.mubr.msk.f32.vlgmr.msra.gmra.mxu1 %vm635_vm3, %v646_v41 }
 0x2d8   : > { %1553 = vmatpush3.xpose.msk.msra.mxu1 %vm555_vm2, %v731_v42  ;;  %1556 = vmatprep.mubr.msk.f32.mxu1 %vm1652_vm1, %v1651_v2 }
 0x2d9   : > { %1554 = vmatprep.subr.mxu1 %v1651_v2 }
 0x2dc   : > { %1555 = vmatpush3.xpose.msk.msra.mxu1 %vm555_vm2, %v729_v23 }
 0x2dd   : > { %1559 = vmatprep.subr.mxu1 %v1651_v2 }
 0x2df   : > { %1557 = vmatmul.mubr.msk.f32.vlgmr.msra.gmra.mxu1 %vm555_vm2, %v727_v25 }
 0x2e0   : > { %1563 = vmatprep.mubr.msk.f32.mxu1 %vm1652_vm1, %v1651_v2 }
 0x2fb   : > { %v982_v43 = vpop.xlane.xlu0 %981 }
 0x2fc   : > { %v983_v45 = vsub.f32 %v976_v31, %v982_v43 }
 0x2fe   : > { %v984_v46 = vmul.f32 1.442695, %v983_v45 }
 0x2ff   : > { %v822_v44 = vpop.permute.xlu0 %821 }
 0x300   : > { %1560 = vmatpush3.msra.mxu1 %v822_v44  ;;  %1629 = vpow2.f32 %v984_v46 }
 0x301   : > { %1561 = vmatprep.subr.mxu1 %v1651_v2 }
 0x30d   : > { %v1630_v51 = vpop.eup %1629 }
 0x30e   : > { %v986_v53 = vsel %vm635_vm3, %v1630_v51, 0.0 }
 0x397   : > { %v1838_v47 = vpop.f32.mrf.mxu1 }
 0x399   : > { %v1551_v48 = vpop.f32.mrf.mxu1 }
 0x39f   : > { %v804_v49 = vpop.f32.mrf.mxu1 }
 0x3a0   : > { %v808_v50 = vsel %vm635_vm3, %v804_v49, -inf }
 0x3a1   : > { %809 = vmax.xlane.f32.xlu1 %v808_v50  ;;  %v1558_v52 = vpop.f32.mrf.mxu1 }
 0x3a5   : > { %987 = vadd.xlane.f32.xlu1 %v986_v53  ;;  %v1472_v53 = vld [vmem:[%s1921_s9] ss:$0 sm:$0xff] }
 0x3b6   : > { %819 = vrot.lane.b32.xlu1 %v1792_v19, %s1656_s28 }
 0x3ba   : > { %993 = vrot.lane.b32.xlu1 %v1783_v14, %s1657_s29 }
 0x3be   : > { %1074 = vrot.lane.b32.xlu1 %v1783_v14, %s1658_s11 }
 0x3c2   : > { %1070 = vrot.lane.b32.xlu1 %v1794_v20, %s1658_s11 }
 0x42a   : > { %v810_v54 = vpop.xlane.xlu1 %809 }
 0x42b   : > { %v811_v55 = vsub.f32 %v804_v49, %v810_v54 }
 0x42d   : > { %v812_v56 = vmul.f32 1.442695, %v811_v55 }
 0x42e   : > { %v988_v57 = vpop.xlane.xlu1 %987 }
 0x42f   : > { %1631 = vpow2.f32 %v812_v56 }
 0x432   : > { %v820_v58 = vpop.permute.xlu1 %819 }
 0x433   : > { %1562 = vmatpush3.msra.mxu1 %v820_v58 }
 0x434   : > { %1573 = vmatprep.subr.mxu1 %v1651_v2 }
 0x436   : > { %v994_v63 = vpop.permute.xlu1 %993 }
 0x43a   : > { %v1075_v5 = vpop.permute.xlu1 %1074 }
 0x43c   : > { %v1632_v59 = vpop.eup %1631 }
 0x43d   : > { %v814_v60 = vsel %vm635_vm3, %v1632_v59, 0.0 }
 0x43e   : > { %815 = vadd.xlane.f32.xlu0 %v814_v60  ;;  %v1071_v7 = vpop.permute.xlu1 %1070 }
 0x454   : > { %991 = vrot.lane.b32.xlu0 %v1792_v19, %s1657_s29 }
 0x458   : > { %1072 = vrot.lane.b32.xlu0 %v1792_v19, %s1658_s11 }
 0x4c7   : > { %v816_v61 = vpop.xlane.xlu0 %815 }
 0x4c8   : > { %1633 = vrcp.f32 %v816_v61 }
 0x4c9   : > { %1635 = vrcp.f32 %v988_v57 }
 0x4cb   : > { %v992_v3 = vpop.permute.xlu0 %991 }
 0x4cf   : > { %v1073_v6 = vpop.permute.xlu0 %1072 }
 0x4d5   : > { %v1634_v62 = vpop.eup %1633 }
 0x4d6   : > { %v818_v0 = vmul.f32 %v1634_v62, %v1632_v59  ;;  %v1636_v1 = vpop.eup %1635 }
 0x4d7   : > { %v990_v4 = vmul.f32 %v1636_v1, %v1630_v51 }
 0x4d8   : > { %1564 = vmatmul.mubr.msk.f32.vlgmr.msra.gmra.mxu1 %vm635_vm3, %v818_v0 }
 0x4d9   : > { %1574 = vmatpush3.msra.mxu1 %v994_v63  ;;  %1577 = vmatprep.mubr.msk.f32.mxu1 %vm1652_vm1, %v1651_v2 }
 0x4da   : > { %1575 = vmatprep.subr.mxu1 %v1651_v2 }
 0x4db   : > { %1576 = vmatpush3.msra.mxu1 %v992_v3 }
 0x4dc   : > { %1580 = vmatprep.subr.mxu1 %v1651_v2  ;;  %1578 = vmatmul.mubr.msk.f32.vlgmr.msra.gmra.mxu1 %vm635_vm3, %v990_v4 }
 0x4dd   : > { %1581 = vmatpush3.xpose.msk.msra.mxu1 %vm555_vm2, %v1075_v5  ;;  %1584 = vmatprep.mubr.msk.f32.mxu1 %vm1652_vm1, %v1651_v2 }
 0x4de   : > { %1582 = vmatprep.subr.mxu1 %v1651_v2 }
 0x4e1   : > { %1583 = vmatpush3.xpose.msk.msra.mxu1 %vm555_vm2, %v1073_v6 }
 0x4e4   : > { %1585 = vmatmul.mubr.msk.f32.vlgmr.msra.gmra.mxu1 %vm555_vm2, %v1071_v7 }
 0x598   : > { %v894_v8 = vpop.f32.mrf.mxu1 }
 0x59a   : > { %v1565_v9 = vpop.f32.mrf.mxu1 }
 0x59c   : > { %v1066_v10 = vpop.f32.mrf.mxu1 }
 0x59e   : > { %v1579_v12 = vpop.f32.mrf.mxu1 }
 0x5a4   : > { %v1148_v13 = vpop.f32.mrf.mxu1 }
 0x5a5   : > { %v1152_v15 = vsel %vm635_vm3, %v1148_v13, -inf }
 0x5a6   : > { %1153 = vmax.xlane.f32.xlu0 %v1152_v15  ;;  %v1586_v16 = vpop.f32.mrf.mxu1 }
 0x5bc   : > { %1165 = vrot.lane.b32.xlu0 %v1783_v14, %s1659_s12 }
 0x5c0   : > { %1243 = vrot.lane.b32.xlu0 %v894_v8, %s1660_s15 }
 0x62f   : > { %v1154_v17 = vpop.xlane.xlu0 %1153 }
 0x630   : > { %v1155_v18 = vsub.f32 %v1148_v13, %v1154_v17 }
 0x632   : > { %v1156_v20 = vmul.f32 1.442695, %v1155_v18 }
 0x633   : > { %v1166_v21 = vpop.permute.xlu0 %1165 }
 0x634   : > { %1637 = vpow2.f32 %v1156_v20  ;;  %1588 = vmatpush3.msra.mxu0 %v1166_v21 }
 0x635   : > { %1589 = vmatprep.subr.mxu0 %v1651_v2 }
 0x637   : > { %v1244_v32 = vpop.permute.xlu0 %1243 }
 0x638   : > { %v1254_v34 = vsel %vm555_vm2, %v1838_v47, %v1244_v32 }
 0x641   : > { %v1638_v22 = vpop.eup %1637 }
 0x642   : > { %v1158_v23 = vsel %vm635_vm3, %v1638_v22, 0.0 }
 0x643   : > { %1159 = vadd.xlane.f32.xlu1 %v1158_v23 }
 0x654   : > { %1163 = vrot.lane.b32.xlu1 %v1792_v19, %s1659_s12  ;;  %v1260_v19 = vld [vmem:[%s1918_s6 + $0x10] sm:$0xff] }
 0x658   : > { %1247 = vrot.lane.b32.xlu1 %v1066_v10, %s1661_s16 }
 0x6cc   : > { %v1160_v24 = vpop.xlane.xlu1 %1159 }
 0x6cd   : > { %1639 = vrcp.f32 %v1160_v24 }
 0x6d0   : > { %v1164_v14 = vpop.permute.xlu1 %1163 }
 0x6d1   : > { %1590 = vmatpush3.msra.mxu0 %v1164_v14 }
 0x6d2   : > { %1594 = vmatprep.subr.mxu0 %v1651_v2 }
 0x6d4   : > { %v1248_v33 = vpop.permute.xlu1 %1247 }
 0x6d5   : > { %v1255_v35 = vsel %vm635_vm3, %v1254_v34, %v1248_v33 }
 0x6da   : > { %v1640_v25 = vpop.eup %1639 }
 0x6db   : > { %v1162_v26 = vmul.f32 %v1640_v25, %v1638_v22 }
 0x6dd   : > { %1592 = vmatmul.mubr.msk.f32.vlgmr.msra.gmra.mxu0 %vm635_vm3, %v1162_v26 }
 0x6de   : > { %1602 = vmatprep.mubr.msk.f32.mxu0 %vm1652_vm1, %v1651_v2  ;;  %1595 = vmatpush3.msra.mxu0 %v1261_v27 }
 0x6df   : > { %1596 = vmatprep.subr.mxu0 %v1651_v2 }
 0x6e0   : > { %1597 = vmatpush3.msra.mxu0 %v1260_v19 }
 0x6e1   : > { %1598 = vmatprep.subr.mxu0 %v1651_v2 }
 0x6e2   : > { %1599 = vmatpush3.msra.mxu0 %v1259_v28 }
 0x6e3   : > { %1600 = vmatprep.subr.mxu0 %v1651_v2  ;;  %v1469_v2 = vld [vmem:[%s1919_s7] ss:$0 sm:$0xff] }
 0x6e4   : > { %1601 = vmatpush3.msra.mxu0 %v1258_v29 }
 0x79d   : > { %v1238_v30 = vpop.f32.mrf.mxu0 }
 0x79e   : > { %1251 = vrot.lane.b32.xlu0 %v1238_v30, %s1662_s25 }
 0x79f   : > { %v1593_v31 = vpop.f32.mrf.mxu0 }
 0x810   : > { %v1252_v36 = vpop.permute.xlu0 %1251 }
 0x811   : > { %v1257_v37 = vsel %vm1256_vm4, %v1255_v35, %v1252_v36 }
 0x812   : > { %1603 = vmatmul.mubr.msk.f32.vlgmr.msra.gmra.mxu0 %vm389_vm0, %v1257_v37 }
 0x8d2   : > { %v1338_v38 = vpop.f32.mrf.mxu0 }
 0x8d3   : > { %v1339_v39 = vadd.f32 %v1469_v2, %v1338_v38 }
 0x8d4   : > { %v1604_v40 = vpop.f32.mrf.mxu0 }
 0x8d5   : > { %v1342_v41 = vadd.f32 %v1339_v39, %v1767_v11  ;;  %v1471_v11 = vld [vmem:[%s1920_s8] ss:$0 sm:$0xff] }
 0x8d7   : > { %v1345_v42 = vsel %vm389_vm0, %v1342_v41, 0.0 }
 0x8d8   : > { %1346 = vadd.xlane.f32.xlu1 %v1345_v42 }
 0x961   : > { %v1347_v43 = vpop.xlane.xlu1 %1346 }
 0x962   : > { %v1349_v44 = vmul.f32 0.03125, %v1347_v43 }
 0x964   : > { %v1350_v45 = vsub.f32 %v1342_v41, %v1349_v44 }
 0x966   : > { %v1351_v46 = vmul.f32 %v1350_v45, %v1350_v45 }
 0x968   : > { %v1352_v47 = vsel %vm389_vm0, %v1351_v46, 0.0 }
 0x969   : > { %1353 = vadd.xlane.f32.xlu0 %v1352_v47 }
 0x9f2   : > { %v1354_v48 = vpop.xlane.xlu0 %1353 }
 0x9f3   : > { %v1355_v49 = vmul.f32 0.03125, %v1354_v48 }
 0x9f5   : > { %v1356_v50 = vadd.f32 1e-05, %v1355_v49 }
 0x9f7   : > { %1641 = vrsqrt.f32 %v1356_v50 }
 0xa04   : > { %v1642_v51 = vpop.eup %1641 }
 0xa05   : > { %v1358_v52 = vmul.f32 %v1642_v51, %v1350_v45 }
 0xa07   : > { %v1365_v54 = vmul.f32 %v1471_v11, %v1358_v52 }
 0xa09   : > { %v1372_v55 = vadd.f32 %v1472_v53, %v1365_v54 }
 0xa0b   : > { %1373 = vst.msk [vmem:[%s374_s17] sm:$0xff] %vm389_vm0, %v1372_v55 }
 0xa0c PF: > { %s20_s13 = sadd.s32 1, %s1649_s13  }
 0xa0d   : > { %p17_p4 = scmp.ge.s32.totalorder %s20_s13, 4  }
 0xa0f   :  { %19 = sbr.rel (!%p17_p4) target bundleno = 1 (0x1), region = 93 }

// kernel: encoder_layer.4
= control target key start
LH: loop header
LB: loop body
LE: loop exit
PB: predicated region body
PF: predicated region fallthrough
CT: control target
= control target key end

     0   :  { %s2015_s17 = smov 0   ;;  %s2224_s0 = inlined_call_operand.vmem [shape: f32[2,16,32], index: 0, kind: input, shape index: {}, may-alias: {0,1}]   ;;  %s2225_s1 = inlined_call_operand.vmem [shape: f32[2,16,32], index: 1, kind: input, shape index: {}, may-alias: {0,1}]   ;;  %s2226_s2 = inlined_call_operand.vmem [shape: f32[2,4,16,16], index: 2, kind: input, shape index: {}]   ;;  %s2227_s3 = inlined_call_operand.vmem [shape: f32[32,32], index: 3, kind: input, shape index: {}]   ;;  %s2228_s4 = inlined_call_operand.vmem [shape: f32[1,32], index: 4, kind: input, shape index: {}]   ;;  %s2229_s5 = inlined_call_operand.vmem [shape: f32[32,64], index: 5, kind: input, shape index: {}]   ;;  %s2230_s6 = inlined_call_operand.vmem [shape: f32[1,64], index: 6, kind: input, shape index: {}]   ;;  %s2231_s7 = inlined_call_operand.vmem [shape: f32[32,32], index: 7, kind: input, shape index: {}]   ;;  %s2232_s8 = inlined_call_operand.vmem [shape: f32[1,32], index: 8, kind: input, shape index: {}]   ;;  %s2233_s9 = inlined_call_operand.vmem [shape: f32[1,32], index: 9, kind: input, shape index: {}]   ;;  %s2234_s10 = inlined_call_operand.vmem [shape: f32[1,32], index: 10, kind: input, shape index: {}]   ;;  %s2235_s11 = inlined_call_operand.vmem [shape: f32[2,16,32], index: 11, kind: output, shape index: {}]  }
   0x1 LB: > { %s1684_s18 = sadd.s32 4294967295, %s1943_s17   ;;  %p1688_p0 = scmp.ge.s32.totalorder %s1943_s17, 1  ;;  %s1943_s17 = sphi %s2015_s17, %s21_s17  }
   0x2   : > { %p357_p1 = scmp.lt.s32.totalorder %s1943_s17, 3 }
   0x4   : > { %p358_p2 = pnand %p1688_p0, %p357_p1 }
   0x5   : > { %p407_p3 = scmp.lt.s32.totalorder (!%p358_p2), %s1684_s18, 1  ;;  %s1945_s29 = smov (!%p358_p2), 96  }
   0x6   : > { %361 = sbr.rel (%p358_p2) target bundleno = 2618 (0xa3a), region = 64  ;;  %s1946_s30 = smov (!%p358_p2), 120  }
   0x7   : > { %s1949_s20 = smov (!%p358_p2), 80   ;;  %s1950_s21 = smov (!%p358_p2), 104  }
   0x8   : > { %s1951_s22 = smov (!%p358_p2), 72   ;;  %s1952_s23 = smov (!%p358_p2), 8  }
   0x9   : > { %s1954_s15 = smov (!%p358_p2), 24  }
   0xb   : > { %v527_v0 = vld [vmem:[%s2229_s5 + $0x18] sm:$0xff]  ;;  %v526_v1 = vld [vmem:[%s2229_s5 + $0x10] sm:$0xff]  ;;  %v525_v4 = vld [vmem:[%s2229_s5 + $0x8] sm:$0xff]  ;;  %s2237_s18 = smov (!%p407_p3, %s1684_s18), 1  ;;  %vm442_vm0 = vcmask 261120   ;;  %vm616_vm1 = vcmask 64512  }
   0xc   : > { %v434_v2 = vld [vmem:[%s2227_s3 + $0x18] sm:$0xff]  ;;  %1805 = vmatprep.subr.mxu1 %v527_v0  ;;  %v433_v3 = vld [vmem:[%s2227_s3 + $0x10] sm:$0xff]  ;;  %v432_v5 = vld [vmem:[%s2227_s3 + $0x8] sm:$0xff]  ;;  %s2047_s14 = sshll.u32 %s2237_s18, 4  ;;  %s1742_s12 = sshll.u32 %s2237_s18, 6  ;;  %vm708_vm2 = vcmask 130048  }
   0xd   : > { %1794 = vmatprep.subr.mxu0 %v434_v2  ;;  %1806 = vmatpush3.msra.mxu1 %v527_v0  ;;  %v524_v6 = vld [vmem:[%s2229_s5] sm:$0xff]  ;;  %s416_s19 = scalar_lea.vmem %s2225_s1, %s2047_s14  ;;  %s411_s24 = scalar_lea.vmem %s2224_s0, %s2047_s14  ;;  %vm1461_vm3 = vcmask 195584  }
   0xe   : > { %1795 = vmatpush3.msra.mxu0 %v434_v2  ;;  %1807 = vmatprep.subr.mxu1 %v526_v1  ;;  %v431_v7 = vld [vmem:[%s2227_s3] sm:$0xff]  ;;  %v430_v9 = vld [vmem:[%s416_s19 + $0x8] sm:$0xff]  ;;  %s2104_s16 = scalar_lea.vmem %s2226_s2, %s1742_s12  ;;  %s1947_s18 = smov 112  }
   0xf   : > { %1796 = vmatprep.subr.mxu0 %v433_v3  ;;  %1808 = vmatpush3.msra.mxu1 %v526_v1  ;;  %v429_v8 = vld [vmem:[%s416_s19] sm:$0xff]  ;;  %v2063_v11 = vld [vmem:[%s411_s24 + $0x8] sm:$0xff]  ;;  %v1714_v59 = vld [vmem:[%s2104_s16 + $0x18] sm:$0xff]  ;;  %s1948_s19 = smov 88   ;;  %s426_s25 = scalar_lea.vmem %s2235_s11, %s2047_s14 }
  0x10   : > { %1797 = vmatpush3.msra.mxu0 %v433_v3  ;;  %1809 = vmatprep.subr.mxu1 %v525_v4  ;;  %v2061_v10 = vld [vmem:[%s411_s24] sm:$0xff]  ;;  %v705_v24 = vld [vmem:[%s2104_s16 + $0x8] sm:$0xff]  ;;  %v1713_v61 = vld [vmem:[%s2104_s16 + $0x10] sm:$0xff]  ;;  %s1953_s24 = smov 16  }
  0x11   : > { %1798 = vmatprep.subr.mxu0 %v432_v5  ;;  %1810 = vmatpush3.msra.mxu1 %v525_v4  ;;  %v1700_v12 = vld [vmem:[%s2230_s6] ss:$0 sm:$0xff] }
  0x12   : > { %1799 = vmatpush3.msra.mxu0 %v432_v5  ;;  %1811 = vmatprep.subr.mxu1 %v524_v6  ;;  %v1697_v17 = vld [vmem:[%s2228_s4] ss:$0 sm:$0xff] }
  0x13   : > { %1813 = vmatprep.mubr.msk.f32.mxu1 %vm442_vm0, %v429_v8  ;;  %1812 = vmatpush3.msra.mxu1 %v524_v6  ;;  %v704_v23 = vld [vmem:[%s2104_s16] sm:$0xff]  ;;  %v1722_v6 = vld [vmem:[%s2104_s16 + $0x28] sm:$0xff] }
  0x14   : > { %1800 = vmatprep.subr.mxu0 %v431_v7  ;;  %1814 = vmatmul.mubr.msk.f32.vlgmr.msra.gmra.mxu1 %vm442_vm0, %v430_v9  ;;  %v1721_v0 = vld [vmem:[%s2104_s16 + $0x20] sm:$0xff] }
  0x15   : > { %1801 = vmatpush3.msra.mxu0 %v431_v7  ;;  %1802 = vmatprep.mubr.msk.f32.mxu0 %vm442_vm0, %v2061_v10 }
  0x16   : > { %1803 = vmatmul.mubr.msk.f32.vlgmr.msra.gmra.mxu0 %vm442_vm0, %v2063_v11 }
  0xd4   : > { %v1815_v13 = vpop.f32.mrf.mxu1 }
  0xd5   : > { %v2073_v14 = vadd.f32 %v1815_v13, %v1700_v12 }
  0xd6   : > { %v607_v15 = vpop.f32.mrf.mxu1  ;;  %v1804_v16 = vpop.f32.mrf.mxu0 }
  0xd7   : > { %v2078_v18 = vadd.f32 %v1700_v12, %v607_v15  ;;  %1816 = vmatprep.subr.msk.mxu0 %vm616_vm1, %v2073_v14  ;;  %v2093_v21 = vadd.f32 %v1804_v16, %v1697_v17 }
  0xd8   : > { %1817 = vmatpush3.xpose.msk.msra.mxu0 %vm616_vm1, %v2073_v14  ;;  %v515_v19 = vpop.f32.mrf.mxu0 }
  0xd9   : > { %731 = vrot.lane.b32.xlu1 %v2078_v18, %s1945_s29  ;;  %v2085_v20 = vadd.f32 %v1697_v17, %v515_v19  ;;  %1818 = vmatprep.subr.msk.mxu0 %vm616_vm1, %v2078_v18 }
  0xdb   : > { %1820 = vmatprep.mubr.msk.f32.mxu0 %vm616_vm1, %v2085_v20 }
  0xdc   : > { %1819 = vmatpush3.xpose.msk.msra.mxu0 %vm616_vm1, %v2078_v18 }
  0xdd   : > { %824 = vrot.lane.b32.xlu1 %v2073_v14, %s1946_s30 }
  0xdf   : > { %1821 = vmatmul.mubr.msk.f32.vlgmr.msra.gmra.mxu0 %vm616_vm1, %v2093_v21 }
  0xe1   : > { %822 = vrot.lane.b32.xlu1 %v2078_v18, %s1946_s30 }
  0xe5   : > { %818 = vrot.lane.b32.xlu1 %v2085_v20, %s1946_s30 }
 0x14b   : > { %v732_v34 = vpop.permute.xlu1 %731 }
 0x14f   : > { %v825_v38 = vpop.permute.xlu1 %824 }
 0x153   : > { %v823_v46 = vpop.permute.xlu1 %822 }
 0x157   : > { %v819_v47 = vpop.permute.xlu1 %818 }
 0x19f   : > { %v1822_v22 = vpop.f32.mrf.mxu0 }
 0x1a0   : > { %v707_v27 = vmul.f32 %v1822_v22, %v705_v24 }
 0x1a1   : > { %v695_v25 = vpop.f32.mrf.mxu0 }
 0x1a2   : > { %v706_v26 = vmul.f32 %v704_v23, %v695_v25  ;;  %v712_v29 = vsel %vm708_vm2, %v707_v27, -inf }
 0x1a4   : > { %v709_v28 = vsel %vm708_vm2, %v706_v26, -inf }
 0x1a5   : > { %710 = vmax.xlane.f32.xlu0 %v709_v28 }
 0x1a9   : > { %713 = vmax.xlane.f32.xlu0 %v712_v29 }
 0x1bf   : > { %733 = vrot.lane.b32.xlu0 %v2073_v14, %s1945_s29 }
 0x1c3   : > { %1029 = vrot.lane.b32.xlu0 %v2073_v14, %s1947_s18 }
 0x1c7   : > { %820 = vrot.lane.b32.xlu0 %v2093_v21, %s1946_s30 }
 0x1cb   : > { %1023 = vrot.lane.b32.xlu0 %v2085_v20, %s1947_s18 }
 0x22e   : > { %v711_v30 = vpop.xlane.xlu0 %710 }
 0x22f   : > { %v715_v31 = vsub.f32 %v706_v26, %v711_v30 }
 0x231   : > { %v717_v35 = vmul.f32 1.442695, %v715_v31 }
 0x232   : > { %v714_v32 = vpop.xlane.xlu0 %713 }
 0x233   : > { %v716_v33 = vsub.f32 %v707_v27, %v714_v32 }
 0x235   : > { %v719_v36 = vmul.f32 1.442695, %v716_v33 }
 0x236   : > { %v734_v37 = vpop.permute.xlu0 %733 }
 0x237   : > { %1901 = vpow2.f32 %v719_v36  ;;  %1823 = vmatprep.subr.mxu1 %v734_v37 }
 0x238   : > { %1824 = vmatpush3.msra.mxu1 %v734_v37  ;;  %1903 = vpow2.f32 %v717_v35 }
 0x239   : > { %1825 = vmatprep.subr.mxu1 %v732_v34 }
 0x23a   : > { %1826 = vmatpush3.msra.mxu1 %v732_v34  ;;  %v1030_v39 = vpop.permute.xlu0 %1029 }
 0x23b   : > { %1830 = vmatprep.subr.msk.mxu1 %vm616_vm1, %v825_v38  ;;  %1844 = vmatprep.subr.msk.mxu0 %vm616_vm1, %v1030_v39 }
 0x23c   : > { %1845 = vmatpush3.xpose.msk.msra.mxu0 %vm616_vm1, %v1030_v39 }
 0x23e   : > { %v821_v40 = vpop.permute.xlu0 %820 }
 0x242   : > { %v1024_v41 = vpop.permute.xlu0 %1023 }
 0x243   : > { %1848 = vmatprep.mubr.msk.f32.mxu0 %vm616_vm1, %v1024_v41 }
 0x244   : > { %v1902_v42 = vpop.eup %1901 }
 0x245   : > { %v724_v43 = vsel %vm708_vm2, %v1902_v42, 0.0  ;;  %v1904_v44 = vpop.eup %1903 }
 0x246   : > { %725 = vadd.xlane.f32.xlu1 %v724_v43  ;;  %v721_v45 = vsel %vm708_vm2, %v1904_v44, 0.0 }
 0x24a   : > { %722 = vadd.xlane.f32.xlu1 %v721_v45 }
 0x25b   : > { %1027 = vrot.lane.b32.xlu1 %v2078_v18, %s1947_s18 }
 0x25f   : > { %1025 = vrot.lane.b32.xlu1 %v2093_v21, %s1947_s18 }
 0x2cf   : > { %v726_v48 = vpop.xlane.xlu1 %725 }
 0x2d0   : > { %1905 = vrcp.f32 %v726_v48 }
 0x2d3   : > { %v723_v49 = vpop.xlane.xlu1 %722 }
 0x2d4   : > { %1907 = vrcp.f32 %v723_v49 }
 0x2d7   : > { %v1028_v50 = vpop.permute.xlu1 %1027 }
 0x2d8   : > { %1846 = vmatprep.subr.msk.mxu0 %vm616_vm1, %v1028_v50 }
 0x2d9   : > { %1847 = vmatpush3.xpose.msk.msra.mxu0 %vm616_vm1, %v1028_v50 }
 0x2db   : > { %v1026_v51 = vpop.permute.xlu1 %1025 }
 0x2dc   : > { %1849 = vmatmul.mubr.msk.f32.vlgmr.msra.gmra.mxu0 %vm616_vm1, %v1026_v51 }
 0x2dd   : > { %v1906_v52 = vpop.eup %1905 }
 0x2de   : > { %v730_v55 = vmul.f32 %v1906_v52, %v1902_v42 }
 0x2e1   : > { %v1908_v53 = vpop.eup %1907 }
 0x2e2   : > { %v729_v54 = vmul.f32 %v1908_v53, %v1904_v44 }
 0x2e4   : > { %1827 = vmatprep.mubr.msk.f32.mxu1 %vm708_vm2, %v729_v54 }
 0x2e5   : > { %1828 = vmatmul.mubr.msk.f32.vlgmr.msra.gmra.mxu1 %vm708_vm2, %v730_v55 }
 0x2e6   : > { %1831 = vmatpush3.xpose.msk.msra.mxu1 %vm616_vm1, %v825_v38  ;;  %1834 = vmatprep.mubr.msk.f32.mxu1 %vm616_vm1, %v819_v47 }
 0x2e7   : > { %1832 = vmatprep.subr.msk.mxu1 %vm616_vm1, %v823_v46 }
 0x2ea   : > { %1833 = vmatpush3.xpose.msk.msra.mxu1 %vm616_vm1, %v823_v46 }
 0x2ed   : > { %1835 = vmatmul.mubr.msk.f32.vlgmr.msra.gmra.mxu1 %vm616_vm1, %v821_v40 }
 0x39c   : > { %v1850_v57 = vpop.f32.mrf.mxu0 }
 0x39d   : > { %v1118_v7 = vmul.f32 %v1850_v57, %v1722_v6 }
 0x39e   : > { %v1105_v63 = vpop.f32.mrf.mxu0 }
 0x39f   : > { %v1117_v4 = vmul.f32 %v1721_v0, %v1105_v63  ;;  %v1122_v9 = vsel %vm708_vm2, %v1118_v7, -inf }
 0x3a1   : > { %v1119_v8 = vsel %vm708_vm2, %v1117_v4, -inf }
 0x3a5   : > { %v2136_v56 = vpop.f32.mrf.mxu1 }
 0x3a7   : > { %v2138_v58 = vpop.f32.mrf.mxu1 }
 0x3ad   : > { %v1836_v60 = vpop.f32.mrf.mxu1 }
 0x3ae   : > { %v913_v62 = vmul.f32 %v1836_v60, %v1714_v59  ;;  %v1730_v60 = vld [vmem:[%s2104_s16 + $0x38] sm:$0xff] }
 0x3af   : > { %v900_v1 = vpop.f32.mrf.mxu1 }
 0x3b0   : > { %v912_v2 = vmul.f32 %v1713_v61, %v900_v1  ;;  %v917_v3 = vsel %vm708_vm2, %v913_v62, -inf }
 0x3b1   : > { %918 = vmax.xlane.f32.xlu1 %v917_v3 }
 0x3b2   : > { %v914_v5 = vsel %vm708_vm2, %v912_v2, -inf }
 0x3b3   : > { %915 = vmax.xlane.f32.xlu0 %v914_v5 }
 0x3b7   : > { %1120 = vmax.xlane.f32.xlu0 %v1119_v8 }
 0x3bb   : > { %1123 = vmax.xlane.f32.xlu0 %v1122_v9 }
 0x43a   : > { %v919_v15 = vpop.xlane.xlu1 %918 }
 0x43b   : > { %v921_v19 = vsub.f32 %v913_v62, %v919_v15  ;;  %v1729_v62 = vld [vmem:[%s2104_s16 + $0x30] sm:$0xff] }
 0x43c   : > { %v916_v12 = vpop.xlane.xlu0 %915 }
 0x43d   : > { %v920_v13 = vsub.f32 %v912_v2, %v916_v12  ;;  %v924_v26 = vmul.f32 1.442695, %v921_v19 }
 0x43f   : > { %v922_v22 = vmul.f32 1.442695, %v920_v13 }
 0x440   : > { %v1121_v16 = vpop.xlane.xlu0 %1120 }
 0x441   : > { %v1125_v17 = vsub.f32 %v1117_v4, %v1121_v16 }
 0x443   : > { %v1127_v23 = vmul.f32 1.442695, %v1125_v17 }
 0x444   : > { %v1124_v24 = vpop.xlane.xlu0 %1123 }
 0x445   : > { %1909 = vpow2.f32 %v1127_v23  ;;  %v1126_v25 = vsub.f32 %v1118_v7, %v1124_v24 }
 0x446   : > { %1911 = vpow2.f32 %v922_v22 }
 0x447   : > { %v1129_v27 = vmul.f32 1.442695, %v1126_v25 }
 0x449   : > { %1913 = vpow2.f32 %v1129_v27  ;;  %v1466_v27 = vld [vmem:[%s2231_s7 + $0x10] sm:$0xff] }
 0x44a   : > { %1915 = vpow2.f32 %v924_v26 }
 0x452   : > { %v1910_v28 = vpop.eup %1909 }
 0x453   : > { %v1131_v29 = vsel %vm708_vm2, %v1910_v28, 0.0  ;;  %v1912_v30 = vpop.eup %1911 }
 0x454   : > { %1132 = vadd.xlane.f32.xlu0 %v1131_v29  ;;  %v926_v32 = vsel %vm708_vm2, %v1912_v30, 0.0  ;;  %v1464_v29 = vld [vmem:[%s2231_s7] sm:$0xff] }
 0x456   : > { %v1914_v31 = vpop.eup %1913 }
 0x457   : > { %v1134_v33 = vsel %vm708_vm2, %v1914_v31, 0.0  ;;  %v1916_v34 = vpop.eup %1915 }
 0x458   : > { %927 = vadd.xlane.f32.xlu0 %v926_v32  ;;  %1135 = vadd.xlane.f32.xlu1 %v1134_v33  ;;  %v929_v35 = vsel %vm708_vm2, %v1916_v34, 0.0 }
 0x45c   : > { %930 = vadd.xlane.f32.xlu1 %v929_v35 }
 0x46d   : > { %936 = vrot.lane.b32.xlu1 %v2078_v18, %s1948_s19 }
 0x46e   : > { %938 = vrot.lane.b32.xlu0 %v2073_v14, %s1948_s19 }
 0x471   : > { %1143 = vrot.lane.b32.xlu1 %v2073_v14, %s1949_s20 }
 0x472   : > { %1234 = vrot.lane.b32.xlu0 %v2073_v14, %s1950_s21 }
 0x475   : > { %1141 = vrot.lane.b32.xlu1 %v2078_v18, %s1949_s20 }
 0x476   : > { %1228 = vrot.lane.b32.xlu0 %v2085_v20, %s1950_s21 }
 0x479   : > { %1232 = vrot.lane.b32.xlu1 %v2078_v18, %s1950_s21 }
 0x47d   : > { %1230 = vrot.lane.b32.xlu1 %v2093_v21, %s1950_s21 }
 0x4dd   : > { %v1133_v36 = vpop.xlane.xlu0 %1132 }
 0x4e1   : > { %v1136_v37 = vpop.xlane.xlu1 %1135  ;;  %v928_v38 = vpop.xlane.xlu0 %927 }
 0x4e2   : > { %1917 = vrcp.f32 %v928_v38 }
 0x4e3   : > { %1919 = vrcp.f32 %v1133_v36 }
 0x4e5   : > { %v931_v39 = vpop.xlane.xlu1 %930  ;;  %v939_v40 = vpop.permute.xlu0 %938 }
 0x4e6   : > { %1921 = vrcp.f32 %v931_v39  ;;  %1837 = vmatprep.subr.mxu1 %v939_v40 }
 0x4e7   : > { %1838 = vmatpush3.msra.mxu1 %v939_v40  ;;  %1923 = vrcp.f32 %v1136_v37 }
 0x4e9   : > { %v937_v41 = vpop.permute.xlu1 %936  ;;  %v1235_v45 = vpop.permute.xlu0 %1234 }
 0x4ea   : > { %1839 = vmatprep.subr.mxu1 %v937_v41 }
 0x4eb   : > { %1840 = vmatpush3.msra.mxu1 %v937_v41 }
 0x4ed   : > { %v1144_v42 = vpop.permute.xlu1 %1143  ;;  %v1229_v51 = vpop.permute.xlu0 %1228 }
 0x4ee   : > { %1851 = vmatprep.subr.mxu1 %v1144_v42 }
 0x4ef   : > { %v1918_v20 = vpop.eup %1917 }
 0x4f0   : > { %v934_v43 = vmul.f32 %v1918_v20, %v1912_v30  ;;  %v1920_v44 = vpop.eup %1919 }
 0x4f1   : > { %v1142_v48 = vpop.permute.xlu1 %1141  ;;  %v1139_v49 = vmul.f32 %v1920_v44, %v1910_v28  ;;  %v1465_v28 = vld [vmem:[%s2231_s7 + $0x8] sm:$0xff] }
 0x4f2   : > { %1841 = vmatprep.mubr.msk.f32.mxu1 %vm708_vm2, %v934_v43 }
 0x4f3   : > { %v1922_v21 = vpop.eup %1921 }
 0x4f4   : > { %v935_v46 = vmul.f32 %v1922_v21, %v1916_v34  ;;  %v1924_v47 = vpop.eup %1923 }
 0x4f5   : > { %v1140_v50 = vmul.f32 %v1924_v47, %v1914_v31  ;;  %v1233_v52 = vpop.permute.xlu1 %1232 }
 0x4f6   : > { %1842 = vmatmul.mubr.msk.f32.vlgmr.msra.gmra.mxu1 %vm708_vm2, %v935_v46 }
 0x4f7   : > { %1852 = vmatpush3.msra.mxu1 %v1144_v42  ;;  %1855 = vmatprep.mubr.msk.f32.mxu1 %vm708_vm2, %v1139_v49 }
 0x4f8   : > { %1853 = vmatprep.subr.mxu1 %v1142_v48 }
 0x4f9   : > { %1854 = vmatpush3.msra.mxu1 %v1142_v48  ;;  %v1231_v53 = vpop.permute.xlu1 %1230 }
 0x4fa   : > { %1858 = vmatprep.subr.msk.mxu1 %vm616_vm1, %v1235_v45  ;;  %1856 = vmatmul.mubr.msk.f32.vlgmr.msra.gmra.mxu1 %vm708_vm2, %v1140_v50 }
 0x4fb   : > { %1859 = vmatpush3.xpose.msk.msra.mxu1 %vm616_vm1, %v1235_v45  ;;  %1862 = vmatprep.mubr.msk.f32.mxu1 %vm616_vm1, %v1229_v51 }
 0x4fc   : > { %1860 = vmatprep.subr.msk.mxu1 %vm616_vm1, %v1233_v52 }
 0x4ff   : > { %1861 = vmatpush3.xpose.msk.msra.mxu1 %vm616_vm1, %v1233_v52 }
 0x502   : > { %1863 = vmatmul.mubr.msk.f32.vlgmr.msra.gmra.mxu1 %vm616_vm1, %v1231_v53 }
 0x5b6   : > { %v1843_v54 = vpop.f32.mrf.mxu1 }
 0x5b8   : > { %v1014_v55 = vpop.f32.mrf.mxu1 }
 0x5ba   : > { %v1857_v57 = vpop.f32.mrf.mxu1 }
 0x5bc   : > { %v1219_v59 = vpop.f32.mrf.mxu1 }
 0x5c2   : > { %v1864_v61 = vpop.f32.mrf.mxu1 }
 0x5c3   : > { %v1323_v63 = vmul.f32 %v1864_v61, %v1730_v60 }
 0x5c4   : > { %v1310_v0 = vpop.f32.mrf.mxu1 }
 0x5c5   : > { %v1322_v1 = vmul.f32 %v1729_v62, %v1310_v0  ;;  %v1327_v2 = vsel %vm708_vm2, %v1323_v63, -inf }
 0x5c6   : > { %1328 = vmax.xlane.f32.xlu1 %v1327_v2  ;;  %v1736_v2 = vld [vmem:[%s2233_s9] ss:$0 sm:$0xff] }
 0x5c7   : > { %v1324_v3 = vsel %vm708_vm2, %v1322_v1, -inf }
 0x5c8   : > { %1325 = vmax.xlane.f32.xlu0 %v1324_v3 }
 0x5d7   : > { %1346 = vrot.lane.b32.xlu1 %v2078_v18, %s1951_s22 }
 0x5db   : > { %1435 = vrot.lane.b32.xlu1 %v1014_v55, %s1952_s23 }
 0x5df   : > { %1437 = vrot.lane.b32.xlu1 %v1843_v54, %s1952_s23 }
 0x5e3   : > { %1445 = vrot.lane.b32.xlu1 %v1857_v57, %s1953_s24 }
 0x64f   : > { %v1329_v4 = vpop.xlane.xlu1 %1328 }
 0x650   : > { %v1331_v5 = vsub.f32 %v1323_v63, %v1329_v4  ;;  %v1737_v4 = vld [vmem:[%s2234_s10] ss:$0 sm:$0xff] }
 0x651   : > { %v1326_v6 = vpop.xlane.xlu0 %1325 }
 0x652   : > { %v1334_v7 = vmul.f32 1.442695, %v1331_v5  ;;  %v1330_v8 = vsub.f32 %v1322_v1, %v1326_v6 }
 0x653   : > { %v1347_v22 = vpop.permute.xlu1 %1346 }
 0x654   : > { %1925 = vpow2.f32 %v1334_v7  ;;  %v1332_v9 = vmul.f32 1.442695, %v1330_v8 }
 0x656   : > { %1927 = vpow2.f32 %v1332_v9 }
 0x657   : > { %v1436_v32 = vpop.permute.xlu1 %1435 }
 0x658   : > { %v1457_v36 = vsel %vm616_vm1, %v2138_v58, %v1436_v32  ;;  %v1733_v58 = vld [vmem:[%s2232_s8] ss:$0 sm:$0xff] }
 0x65b   : > { %v1438_v33 = vpop.permute.xlu1 %1437 }
 0x65c   : > { %v1458_v38 = vsel %vm616_vm1, %v2136_v56, %v1438_v33 }
 0x65f   : > { %v1446_v34 = vpop.permute.xlu1 %1445 }
 0x660   : > { %v1460_v41 = vsel %vm708_vm2, %v1458_v38, %v1446_v34 }
 0x661   : > { %v1926_v12 = vpop.eup %1925 }
 0x662   : > { %v1339_v13 = vsel %vm708_vm2, %v1926_v12, 0.0 }
 0x663   : > { %v1928_v15 = vpop.eup %1927  ;;  %1340 = vadd.xlane.f32.xlu0 %v1339_v13 }
 0x664   : > { %v1336_v18 = vsel %vm708_vm2, %v1928_v15, 0.0 }
 0x667   : > { %1337 = vadd.xlane.f32.xlu0 %v1336_v18 }
 0x67d   : > { %1348 = vrot.lane.b32.xlu0 %v2073_v14, %s1951_s22  ;;  %v1467_v14 = vld [vmem:[%s2231_s7 + $0x18] sm:$0xff] }
 0x681   : > { %1443 = vrot.lane.b32.xlu0 %v1219_v59, %s1953_s24 }
 0x6ec   : > { %v1341_v16 = vpop.xlane.xlu0 %1340 }
 0x6ed   : > { %1929 = vrcp.f32 %v1341_v16 }
 0x6f0   : > { %v1338_v17 = vpop.xlane.xlu0 %1337 }
 0x6f1   : > { %1931 = vrcp.f32 %v1338_v17 }
 0x6f4   : > { %v1349_v19 = vpop.permute.xlu0 %1348 }
 0x6f5   : > { %1865 = vmatprep.subr.mxu0 %v1349_v19 }
 0x6f6   : > { %1866 = vmatpush3.msra.mxu0 %v1349_v19 }
 0x6f7   : > { %1867 = vmatprep.subr.mxu0 %v1347_v22 }
 0x6f8   : > { %1868 = vmatpush3.msra.mxu0 %v1347_v22  ;;  %v1444_v35 = vpop.permute.xlu0 %1443 }
 0x6f9   : > { %1872 = vmatprep.subr.mxu0 %v1467_v14  ;;  %v1459_v39 = vsel %vm708_vm2, %v1457_v36, %v1444_v35 }
 0x6fa   : > { %v1930_v23 = vpop.eup %1929 }
 0x6fb   : > { %v1345_v26 = vmul.f32 %v1930_v23, %v1926_v12 }
 0x6fe   : > { %v1932_v24 = vpop.eup %1931 }
 0x6ff   : > { %v1344_v25 = vmul.f32 %v1932_v24, %v1928_v15 }
 0x701   : > { %1869 = vmatprep.mubr.msk.f32.mxu0 %vm708_vm2, %v1344_v25 }
 0x702   : > { %1870 = vmatmul.mubr.msk.f32.vlgmr.msra.gmra.mxu0 %vm708_vm2, %v1345_v26 }
 0x703   : > { %1873 = vmatpush3.msra.mxu0 %v1467_v14 }
 0x704   : > { %1874 = vmatprep.subr.mxu0 %v1466_v27 }
 0x705   : > { %1875 = vmatpush3.msra.mxu0 %v1466_v27 }
 0x706   : > { %1876 = vmatprep.subr.mxu0 %v1465_v28 }
 0x707   : > { %1877 = vmatpush3.msra.mxu0 %v1465_v28 }
 0x708   : > { %1878 = vmatprep.subr.mxu0 %v1464_v29 }
 0x709   : > { %1879 = vmatpush3.msra.mxu0 %v1464_v29 }
 0x7c2   : > { %v1871_v30 = vpop.f32.mrf.mxu0 }
 0x7c3   : > { %1453 = vrot.lane.b32.xlu1 %v1871_v30, %s1954_s15 }
 0x7c4   : > { %v1424_v31 = vpop.f32.mrf.mxu0 }
 0x7c5   : > { %1451 = vrot.lane.b32.xlu0 %v1424_v31, %s1954_s15 }
 0x835   : > { %v1454_v37 = vpop.permute.xlu1 %1453 }
 0x836   : > { %v1463_v20 = vsel %vm1461_vm3, %v1460_v41, %v1454_v37 }
 0x837   : > { %v1452_v40 = vpop.permute.xlu0 %1451 }
 0x838   : > { %v1462_v42 = vsel %vm1461_vm3, %v1459_v39, %v1452_v40 }
 0x839   : > { %1880 = vmatprep.mubr.msk.f32.mxu0 %vm442_vm0, %v1462_v42 }
 0x83a   : > { %1881 = vmatmul.mubr.msk.f32.vlgmr.msra.gmra.mxu0 %vm442_vm0, %v1463_v20 }
 0x8fa   : > { %v1882_v43 = vpop.f32.mrf.mxu0 }
 0x8fb   : > { %v1553_v44 = vadd.f32 %v1882_v43, %v1733_v58 }
 0x8fc   : > { %v1547_v21 = vpop.f32.mrf.mxu0 }
 0x8fd   : > { %v1548_v45 = vadd.f32 %v1733_v58, %v1547_v21  ;;  %v1557_v56 = vadd.f32 %v1553_v44, %v2063_v11 }
 0x8ff   : > { %v1563_v46 = vsel %vm442_vm0, %v1557_v56, 0.0  ;;  %v1556_v47 = vadd.f32 %v1548_v45, %v2061_v10 }
 0x900   : > { %1564 = vadd.xlane.f32.xlu1 %v1563_v46 }
 0x901   : > { %v1560_v48 = vsel %vm442_vm0, %v1556_v47, 0.0 }
 0x902   : > { %1561 = vadd.xlane.f32.xlu0 %v1560_v48 }
 0x989   : > { %v1565_v49 = vpop.xlane.xlu1 %1564 }
 0x98a   : > { %v1568_v50 = vmul.f32 0.03125, %v1565_v49 }
 0x98b   : > { %v1562_v51 = vpop.xlane.xlu0 %1561 }
 0x98c   : > { %v1567_v52 = vmul.f32 0.03125, %v1562_v51  ;;  %v1570_v53 = vsub.f32 %v1557_v56, %v1568_v50 }
 0x98e   : > { %v1569_v54 = vsub.f32 %v1556_v47, %v1567_v52  ;;  %v1572_v59 = vmul.f32 %v1570_v53, %v1570_v53 }
 0x990   : > { %v1571_v55 = vmul.f32 %v1569_v54, %v1569_v54  ;;  %v1576_v11 = vsel %vm442_vm0, %v1572_v59, 0.0 }
 0x992   : > { %v1573_v57 = vsel %vm442_vm0, %v1571_v55, 0.0 }
 0x993   : > { %1574 = vadd.xlane.f32.xlu0 %v1573_v57 }
 0x997   : > { %1577 = vadd.xlane.f32.xlu0 %v1576_v11 }
 0xa1c   : > { %v1575_v10 = vpop.xlane.xlu0 %1574 }
 0xa1d   : > { %v1579_v60 = vmul.f32 0.03125, %v1575_v10 }
 0xa1f   : > { %v1581_v61 = vadd.f32 1e-05, %v1579_v60 }
 0xa20   : > { %v1578_v62 = vpop.xlane.xlu0 %1577 }
 0xa21   : > { %1933 = vrsqrt.f32 %v1581_v61  ;;  %v1580_v63 = vmul.f32 0.03125, %v1578_v62 }
 0xa23   : > { %v1582_v0 = vadd.f32 1e-05, %v1580_v63 }
 0xa25   : > { %1935 = vrsqrt.f32 %v1582_v0 }
 0xa2e   : > { %v1934_v1 = vpop.eup %1933 }
 0xa2f   : > { %v1585_v3 = vmul.f32 %v1934_v1, %v1569_v54 }
 0xa31   : > { %v1593_v5 = vmul.f32 %v1736_v2, %v1585_v3 }
 0xa32   : > { %v1936_v6 = vpop.eup %1935 }
 0xa33   : > { %v1601_v7 = vadd.f32 %v1737_v4, %v1593_v5  ;;  %v1586_v8 = vmul.f32 %v1936_v6, %v1570_v53 }
 0xa35   : > { %1603 = vst.msk [vmem:[%s426_s25] sm:$0xff] %vm442_vm0, %v1601_v7  ;;  %v1594_v9 = vmul.f32 %v1736_v2, %v1586_v8 }
 0xa37   : > { %v1602_v12 = vadd.f32 %v1737_v4, %v1594_v9 }
 0xa39   : > { %1604 = vst.msk [vmem:[%s426_s25 + $0x8] sm:$0xff] %vm442_vm0, %v1602_v12 }
 0xa3a PF: > { %s21_s17 = sadd.s32 1, %s1943_s17  }
 0xa3b   : > { %p18_p4 = scmp.ge.s32.totalorder %s21_s17, 4  }
 0xa3d   :  { %20 = sbr.rel (!%p18_p4) target bundleno = 1 (0x1), region = 103 }

</bundles_post_ra>
